<compile_context>
chip_gen: v7x
topology: tpu7x:2x2x1
jax: 0.10.0
libtpu: 0.0.40
codegen_flags: <defaults>
</compile_context>

<pallas_src>
import functools

import jax
import jax.numpy as jnp
from jax.experimental import pallas as pl
from jax.experimental.pallas import tpu as pltpu

BN_EPS = 1e-5
_VMEM_LIMIT = 32 * 1024 * 1024   # safe scoped limit on v5e/v6e/v7x


# ---------------------------------------------------------------------------
# Fused stage kernel (one grid step == one batch image).
#   x_ref      : (1, Hp, Wp*Cin)     pre-padded, lane-packed activation
#   mean/inv   : (1, Wp*Cin)         previous BN stats (stage 2 only)
#   wdw_ref    : (K*K, Wo_f*Cin)     depthwise weights tiled along packed lanes
#   wbig_ref   : (Wo_f*Cin, W_out*Cout)  block-diag 1x1 conv (+W-stride, +W-pad)
#   rowemb_ref : (H_out, Ho_f)       0/1 row selection/embedding (+H-stride/pad)
#   outputs    : y (1, H_out, W_out*Cout), BN partial sum / M2 (1, 1, W_out*Cout)
# ---------------------------------------------------------------------------
def _make_stage_kernel(*, K, stride, Cin, Hp, Wp, in_pad, out_pad,
                       apply_input_bn, use_rowemb):
    Ho_f, Wo_f = Hp - K + 1, Wp - K + 1
    Ho = (Hp - K) // stride + 1
    H_valid, W_valid = Hp - 2 * in_pad, Wp - 2 * in_pad

    def kernel(*refs):
        it = iter(refs)
        x_ref = next(it)
        mean_ref = inv_ref = None
        if apply_input_bn:
            mean_ref = next(it)
            inv_ref = next(it)
        wdw_ref = next(it)
        wbig_ref = next(it)
        rowemb_ref = next(it) if use_rowemb else None
        y_ref = next(it)
        sum_ref = next(it)
        m2_ref = next(it)

        x = x_ref[0].astype(jnp.float32)                      # (Hp, Wp*Cin)
        if apply_input_bn:
            # Previous stage's BatchNorm + ReLU, fused into this stage's load.
            x = jnp.maximum((x - mean_ref[...]) * inv_ref[...], 0.0)
            if in_pad > 0:
                # Re-zero the embedded spatial border (padding is applied
                # AFTER BN+ReLU in the reference pipeline).
                ri = jax.lax.broadcasted_iota(jnp.int32, (Hp, Wp * Cin), 0)
                ci = jax.lax.broadcasted_iota(jnp.int32, (Hp, Wp * Cin), 1)
                keep = ((ri >= in_pad) & (ri < in_pad + H_valid)
                        & (ci >= in_pad * Cin) & (ci < (in_pad + W_valid) * Cin))
                x = jnp.where(keep, x, 0.0)

        # Depthwise KxK conv at stride 1, lane-packed: unit-stride value slices.
        wdw = wdw_ref[...]                                    # (K*K, Wo_f*Cin)
        acc = None
        for kh in range(K):
            for kw in range(K):
                kk = kh * K + kw
                term = (x[kh:kh + Ho_f, kw * Cin:kw * Cin + Wo_f * Cin]
                        * wdw[kk:kk + 1, :])
                acc = term if acc is None else acc + term     # (Ho_f, Wo_f*Cin)

        if use_rowemb:
            # H-stride decimation and/or H-pad embedding as a 0/1 matmul.
            acc = jnp.dot(rowemb_ref[...], acc,
                          preferred_element_type=jnp.float32)

        # 1x1 pointwise conv (+ W-stride decimation + W-pad embedding) as one
        # matmul against a block-diagonal weight; output stays lane-packed.
        y = jnp.dot(acc, wbig_ref[...], preferred_element_type=jnp.float32)
        y_ref[0] = y.astype(y_ref.dtype)

        # BN partials per packed column over the VALID rows only (border rows
        # are exact zeros and excluded).  Combined with Chan's formula outside.
        y_valid = y[out_pad:out_pad + Ho, :] if out_pad > 0 else y
        col_sum = jnp.sum(y_valid, axis=0, keepdims=True)
        mu = col_sum * (1.0 / Ho)
        d = y_valid - mu
        sum_ref[0] = col_sum
        m2_ref[0] = jnp.sum(d * d, axis=0, keepdims=True)

    return kernel


def _fused_stage(x, wdw_tiled, wbig, rowemb, *, K, stride, in_pad, out_pad,
                 Cin, Cout, apply_input_bn, in_mean=None, in_inv=None):
    N, Hp, WPC = x.shape
    Wp = WPC // Cin
    Ho_f, Wo_f = Hp - K + 1, Wp - K + 1
    Ho = (Hp - K) // stride + 1
    Wo = (Wp - K) // stride + 1
    H_out, W_out = Ho + 2 * out_pad, Wo + 2 * out_pad
    use_rowemb = rowemb is not None

    kernel = _make_stage_kernel(K=K, stride=stride, Cin=Cin, Hp=Hp, Wp=Wp,
                                in_pad=in_pad, out_pad=out_pad,
                                apply_input_bn=apply_input_bn,
                                use_rowemb=use_rowemb)

    in_specs = [pl.BlockSpec((1, Hp, WPC), lambda n: (n, 0, 0))]
    inputs = [x]
    if apply_input_bn:
        in_specs += [pl.BlockSpec((1, WPC), lambda n: (0, 0)),
                     pl.BlockSpec((1, WPC), lambda n: (0, 0))]
        inputs += [in_mean, in_inv]
    in_specs += [pl.BlockSpec((K * K, Wo_f * Cin), lambda n: (0, 0)),
                 pl.BlockSpec((Wo_f * Cin, W_out * Cout), lambda n: (0, 0))]
    inputs += [wdw_tiled, wbig]
    if use_rowemb:
        in_specs += [pl.BlockSpec((H_out, Ho_f), lambda n: (0, 0))]
        inputs += [rowemb]

    out_shape = (jax.ShapeDtypeStruct((N, H_out, W_out * Cout), x.dtype),
                 jax.ShapeDtypeStruct((N, 1, W_out * Cout), jnp.float32),
                 jax.ShapeDtypeStruct((N, 1, W_out * Cout), jnp.float32))
    out_specs = (pl.BlockSpec((1, H_out, W_out * Cout), lambda n: (n, 0, 0)),
                 pl.BlockSpec((1, 1, W_out * Cout), lambda n: (n, 0, 0)),
                 pl.BlockSpec((1, 1, W_out * Cout), lambda n: (n, 0, 0)))

    y, col_sums, col_m2s = pl.pallas_call(
        kernel,
        out_shape=out_shape,
        grid=(N,),
        in_specs=in_specs,
        out_specs=out_specs,
        compiler_params=pltpu.CompilerParams(
            dimension_semantics=("parallel",),
            vmem_limit_bytes=_VMEM_LIMIT),
    )(*inputs)
    return y, col_sums, col_m2s, Ho, Wo


# ---------------------------------------------------------------------------
# Chan (parallel) combine of the per-(image, column) BN partials -> mean/invstd
# (exact biased variance, no E[y^2]-mean^2 cancellation).  Tiny XLA-side work.
# ---------------------------------------------------------------------------
def _combine_bn_stats(col_sums, col_m2s, *, rows, out_pad, W_valid, C):
    N = col_sums.shape[0]
    W_tot = col_sums.shape[-1] // C
    sums = col_sums.reshape(N, W_tot, C)
    m2s = col_m2s.reshape(N, W_tot, C)
    if out_pad > 0:
        sums = sums[:, out_pad:out_pad + W_valid, :]
        m2s = m2s[:, out_pad:out_pad + W_valid, :]
    cnt = float(rows)
    total = float(N * W_valid * rows)
    mean = jnp.sum(sums, axis=(0, 1)) / total
    mu_g = sums / cnt
    var = (jnp.sum(m2s, axis=(0, 1))
           + cnt * jnp.sum((mu_g - mean) ** 2, axis=(0, 1))) / total
    inv_std = jax.lax.rsqrt(var + BN_EPS)
    return mean, inv_std


# ---------------------------------------------------------------------------
# Final BatchNorm + ReLU: row-tiled, lane-dense, parallel grid.
# ---------------------------------------------------------------------------
def _bn_relu_kernel(y_ref, mean_ref, inv_ref, o_ref):
    y = y_ref[...].astype(jnp.float32)
    o_ref[...] = jnp.maximum((y - mean_ref[...]) * inv_ref[...], 0.0).astype(o_ref.dtype)


def _pick_row_tile(rows):
    fallback = None
    for cand in (1024, 512, 256, 128, 64, 32, 16, 8):
        if rows % cand == 0:
            if rows // cand >= 4:      # enough grid steps for pipelining/megacore
                return cand
            if fallback is None:
                fallback = cand
    return fallback if fallback is not None else rows


def _bn_relu(y, mean_p, inv_p):
    N, Ho, L = y.shape
    R = N * Ho
    y2 = y.reshape(R, L)               # free reshape; lane-dense (R, W*C) slab
    tile_r = _pick_row_tile(R)
    out = pl.pallas_call(
        _bn_relu_kernel,
        out_shape=jax.ShapeDtypeStruct((R, L), y.dtype),
        grid=(R // tile_r,),
        in_specs=[pl.BlockSpec((tile_r, L), lambda i: (i, 0)),
                  pl.BlockSpec((1, L), lambda i: (0, 0)),
                  pl.BlockSpec((1, L), lambda i: (0, 0))],
        out_specs=pl.BlockSpec((tile_r, L), lambda i: (i, 0)),
        compiler_params=pltpu.CompilerParams(
            dimension_semantics=("parallel",),
            vmem_limit_bytes=_VMEM_LIMIT),
    )(y2, mean_p, inv_p)
    return out.reshape(N, Ho, L)


# ---------------------------------------------------------------------------
# Wrapper-side (tiny, weight-only) preprocessing for the fused stage kernels.
# ---------------------------------------------------------------------------
def _prep_stage_weights(w_dw, w_pw, *, K, stride, out_pad, Hp, Wp):
    Cin, Cout = w_pw.shape
    Ho_f, Wo_f = Hp - K + 1, Wp - K + 1
    Ho = (Hp - K) // stride + 1
    Wo = (Wp - K) // stride + 1
    Ho_p, Wo_p = Ho + 2 * out_pad, Wo + 2 * out_pad

    # Depthwise weights tiled along the packed W*C lane axis: (K*K, Wo_f*Cin).
    wdw_tiled = jnp.tile(w_dw.reshape(K * K, 1, Cin),
                         (1, Wo_f, 1)).reshape(K * K, Wo_f * Cin)

    # 1x1 pointwise conv as a block-diagonal matrix on packed lanes, with the
    # W-direction stride decimation AND the W-direction output-pad embedding
    # folded in (border output columns stay exactly zero).
    wbig = jnp.zeros((Wo_f, Cin, Wo_p, Cout), w_pw.dtype)
    wbig = wbig.at[jnp.arange(Wo) * stride, :, out_pad + jnp.arange(Wo), :].set(w_pw)
    wbig = wbig.reshape(Wo_f * Cin, Wo_p * Cout)

    # 0/1 row selection matrix: H-direction stride + H-direction pad embedding.
    rowemb = None
    if stride > 1 or out_pad > 0:
        rowemb = jnp.zeros((Ho_p, Ho_f), jnp.float32)
        rowemb = rowemb.at[out_pad + jnp.arange(Ho), jnp.arange(Ho) * stride].set(1.0)
    return wdw_tiled, wbig, rowemb


# ---------------------------------------------------------------------------
# Full Sep_Conv forward (public wrapper: NCHW in / NCHW out).
# ---------------------------------------------------------------------------
def sep_conv_forward(x_nchw, params, *, kernel_size, stride, padding):
    N, Cin, H, W = x_nchw.shape
    K, pad = kernel_size, padding
    Cmid = params["pw1"].shape[1]
    Cout = params["pw2"].shape[1]

    # NCHW -> padded, lane-packed (N, Hp, Wp*Cin); pad fused into the layout
    # transform (single cheap XLA op, no extra HBM round trip).
    x = jnp.transpose(x_nchw, (0, 2, 3, 1))
    x = jnp.pad(x, ((0, 0), (pad, pad), (pad, pad), (0, 0)))
    Hp, Wp = H + 2 * pad, W + 2 * pad
    x = x.reshape(N, Hp, Wp * Cin)

    # ---- stage 1: dw(K, stride) + 1x1 (fused, BN partials, pad-embedded out)
    wdw1, wbig1, rowemb1 = _prep_stage_weights(params["dw1"], params["pw1"],
                                               K=K, stride=stride, out_pad=pad,
                                               Hp=Hp, Wp=Wp)
    y1, s1, m21, H1, W1 = _fused_stage(x, wdw1, wbig1, rowemb1,
                                       K=K, stride=stride, in_pad=pad,
                                       out_pad=pad, Cin=Cin, Cout=Cmid,
                                       apply_input_bn=False)
    mean1, inv1 = _combine_bn_stats(s1, m21, rows=H1, out_pad=pad,
                                    W_valid=W1, C=Cmid)
    W1p, H1p = W1 + 2 * pad, H1 + 2 * pad
    mean1_p = jnp.tile(mean1, W1p)[None, :]
    inv1_p = jnp.tile(inv1, W1p)[None, :]

    # ---- stage 2: BN1+ReLU + dw(K, 1) + 1x1 (fused, BN partials) ------------
    wdw2, wbig2, rowemb2 = _prep_stage_weights(params["dw2"], params["pw2"],
                                               K=K, stride=1, out_pad=0,
                                               Hp=H1p, Wp=W1p)
    y2, s2, m22, H2, W2 = _fused_stage(y1, wdw2, wbig2, rowemb2,
                                       K=K, stride=1, in_pad=pad,
                                       out_pad=0, Cin=Cmid, Cout=Cout,
                                       apply_input_bn=True,
                                       in_mean=mean1_p, in_inv=inv1_p)
    mean2, inv2 = _combine_bn_stats(s2, m22, rows=H2, out_pad=0,
                                    W_valid=W2, C=Cout)
    mean2_p = jnp.tile(mean2, W2)[None, :]
    inv2_p = jnp.tile(inv2, W2)[None, :]

    # ---- final BN2 + ReLU (row-tiled, lane-dense) ----------------------------
    out = _bn_relu(y2, mean2_p, inv2_p)                 # (N, H2, W2*Cout)
    out = out.reshape(N, H2, W2, Cout)
    return jnp.transpose(out, (0, 3, 1, 2))             # back to NCHW


# ---------------------------------------------------------------------------
# Deterministic parameter init (shapes from the PyTorch __init__).
# ---------------------------------------------------------------------------
def init_params(key, C_in, C_out, K):
    k1, k2, k3, k4 = jax.random.split(key, 4)
    dw1_t = jax.random.normal(k1, (C_in, 1, K, K), jnp.float32) * 0.2
    pw1_t = jax.random.normal(k2, (C_in, C_in, 1, 1), jnp.float32) * 0.2
    dw2_t = jax.random.normal(k3, (C_in, 1, K, K), jnp.float32) * 0.2
    pw2_t = jax.random.normal(k4, (C_out, C_in, 1, 1), jnp.float32) * 0.2
    pallas_params = {
        "dw1": jnp.transpose(dw1_t[:, 0], (1, 2, 0)),        # (K, K, C_in)
        "pw1": jnp.transpose(pw1_t[:, :, 0, 0], (1, 0)),     # (C_in, C_in)
        "dw2": jnp.transpose(dw2_t[:, 0], (1, 2, 0)),        # (K, K, C_in)
        "pw2": jnp.transpose(pw2_t[:, :, 0, 0], (1, 0)),     # (C_in, C_out)
    }
    torch_layout = {"dw1": dw1_t, "pw1": pw1_t, "dw2": dw2_t, "pw2": pw2_t}
    return pallas_params, torch_layout


# ---------------------------------------------------------------------------
# Pure-JAX reference (mirrors the PyTorch module) for a correctness check.
# ---------------------------------------------------------------------------
def ref_forward(x_nchw, tp, *, kernel_size, stride, padding):
    def dw(x, w, s):
        C = x.shape[1]
        return jax.lax.conv_general_dilated(
            x, w, (s, s), [(padding, padding)] * 2,
            feature_group_count=C,
            dimension_numbers=("NCHW", "OIHW", "NCHW"))

    def pw(x, w):
        return jax.lax.conv_general_dilated(
            x, w, (1, 1), [(0, 0), (0, 0)],
            dimension_numbers=("NCHW", "OIHW", "NCHW"))

    def bn_relu(x):
        mean = jnp.mean(x, axis=(0, 2, 3), keepdims=True)
        var = jnp.mean((x - mean) ** 2, axis=(0, 2, 3), keepdims=True)
        return jnp.maximum((x - mean) * jax.lax.rsqrt(var + BN_EPS), 0.0)

    y = dw(x_nchw, tp["dw1"], stride)
    y = bn_relu(pw(y, tp["pw1"]))
    y = dw(y, tp["dw2"], 1)
    y = bn_relu(pw(y, tp["pw2"]))
    return y


if __name__ == "__main__":
    # Sep_Conv(C_in=4, C_out=8, kernel_size=3, stride=1, padding=1)
    N, C_in, C_out, H, W = 2, 4, 8, 16, 16
    K, stride, padding = 3, 1, 1

    key = jax.random.PRNGKey(0)
    kx, kp = jax.random.split(key)
    x = jax.random.normal(kx, (N, C_in, H, W), jnp.float32)
    params, torch_params = init_params(kp, C_in, C_out, K)

    fwd = jax.jit(functools.partial(sep_conv_forward, kernel_size=K,
                                    stride=stride, padding=padding))
    out = jax.block_until_ready(fwd(x, params))

    ref = ref_forward(x, torch_params, kernel_size=K, stride=stride,
                      padding=padding)
    assert out.shape == (N, C_out, H, W), out.shape
    max_err = float(jnp.max(jnp.abs(out - ref)))
    assert jnp.allclose(out, ref, rtol=2e-3, atol=2e-3), max_err

    print("KERNEL_OK")
</pallas_src>

<mosaic_0001>
module attributes {stable_mosaic.version = 11 : i64} {
  func.func @kernel(%arg0: i32, %arg1: memref<1x18x72xf32, #tpu.memory_space<vmem>>, %arg2: memref<9x64xf32, #tpu.memory_space<vmem>>, %arg3: memref<64x72xf32, #tpu.memory_space<vmem>>, %arg4: memref<18x16xf32, #tpu.memory_space<vmem>>, %arg5: memref<1x18x72xf32, #tpu.memory_space<vmem>>, %arg6: memref<1x1x72xf32, #tpu.memory_space<vmem>>, %arg7: memref<1x1x72xf32, #tpu.memory_space<vmem>>) attributes {dimension_semantics = [#tpu.dimension_semantics<parallel>], iteration_bounds = array<i64: 2>, scalar_prefetch = 0 : i64, scratch_operands = 0 : i64, tpu.core_type = #tpu.core_type<tc>, window_params = [{transform_indices = @transform_0, window_bounds = array<i64: 1, 18, 72>}, {pipeline_mode = #tpu.pipeline_mode<synchronous>, transform_indices = @transform_1, window_bounds = array<i64: 9, 64>}, {pipeline_mode = #tpu.pipeline_mode<synchronous>, transform_indices = @transform_2, window_bounds = array<i64: 64, 72>}, {pipeline_mode = #tpu.pipeline_mode<synchronous>, transform_indices = @transform_3, window_bounds = array<i64: 18, 16>}, {transform_indices = @transform_4, window_bounds = array<i64: 1, 18, 72>}, {transform_indices = @transform_5, window_bounds = array<i64: 1, 1, 72>}, {transform_indices = @transform_6, window_bounds = array<i64: 1, 1, 72>}]} {
    %c0 = arith.constant 0 : index
    %c0_0 = arith.constant 0 : index
    %c0_1 = arith.constant 0 : index
    %0 = vector.load %arg1[%c0, %c0_0, %c0_1] : memref<1x18x72xf32, #tpu.memory_space<vmem>>, vector<1x18x72xf32>
    %1 = vector.shape_cast %0 : vector<1x18x72xf32> to vector<18x72xf32>
    %c0_2 = arith.constant 0 : index
    %c0_3 = arith.constant 0 : index
    %2 = vector.load %arg2[%c0_2, %c0_3] : memref<9x64xf32, #tpu.memory_space<vmem>>, vector<9x64xf32>
    %3 = vector.extract_strided_slice %1 {offsets = [0, 0], sizes = [16, 64], strides = [1, 1]} : vector<18x72xf32> to vector<16x64xf32>
    %4 = vector.extract_strided_slice %2 {offsets = [0, 0], sizes = [1, 64], strides = [1, 1]} : vector<9x64xf32> to vector<1x64xf32>
    %5 = vector.broadcast %4 : vector<1x64xf32> to vector<16x64xf32>
    %6 = arith.mulf %3, %5 : vector<16x64xf32>
    %7 = vector.extract_strided_slice %1 {offsets = [0, 4], sizes = [16, 64], strides = [1, 1]} : vector<18x72xf32> to vector<16x64xf32>
    %8 = vector.extract_strided_slice %2 {offsets = [1, 0], sizes = [1, 64], strides = [1, 1]} : vector<9x64xf32> to vector<1x64xf32>
    %9 = vector.broadcast %8 : vector<1x64xf32> to vector<16x64xf32>
    %10 = arith.mulf %7, %9 : vector<16x64xf32>
    %11 = arith.addf %6, %10 : vector<16x64xf32>
    %12 = vector.extract_strided_slice %1 {offsets = [0, 8], sizes = [16, 64], strides = [1, 1]} : vector<18x72xf32> to vector<16x64xf32>
    %13 = vector.extract_strided_slice %2 {offsets = [2, 0], sizes = [1, 64], strides = [1, 1]} : vector<9x64xf32> to vector<1x64xf32>
    %14 = vector.broadcast %13 : vector<1x64xf32> to vector<16x64xf32>
    %15 = arith.mulf %12, %14 : vector<16x64xf32>
    %16 = arith.addf %11, %15 : vector<16x64xf32>
    %17 = vector.extract_strided_slice %1 {offsets = [1, 0], sizes = [16, 64], strides = [1, 1]} : vector<18x72xf32> to vector<16x64xf32>
    %18 = vector.extract_strided_slice %2 {offsets = [3, 0], sizes = [1, 64], strides = [1, 1]} : vector<9x64xf32> to vector<1x64xf32>
    %19 = vector.broadcast %18 : vector<1x64xf32> to vector<16x64xf32>
    %20 = arith.mulf %17, %19 : vector<16x64xf32>
    %21 = arith.addf %16, %20 : vector<16x64xf32>
    %22 = vector.extract_strided_slice %1 {offsets = [1, 4], sizes = [16, 64], strides = [1, 1]} : vector<18x72xf32> to vector<16x64xf32>
    %23 = vector.extract_strided_slice %2 {offsets = [4, 0], sizes = [1, 64], strides = [1, 1]} : vector<9x64xf32> to vector<1x64xf32>
    %24 = vector.broadcast %23 : vector<1x64xf32> to vector<16x64xf32>
    %25 = arith.mulf %22, %24 : vector<16x64xf32>
    %26 = arith.addf %21, %25 : vector<16x64xf32>
    %27 = vector.extract_strided_slice %1 {offsets = [1, 8], sizes = [16, 64], strides = [1, 1]} : vector<18x72xf32> to vector<16x64xf32>
    %28 = vector.extract_strided_slice %2 {offsets = [5, 0], sizes = [1, 64], strides = [1, 1]} : vector<9x64xf32> to vector<1x64xf32>
    %29 = vector.broadcast %28 : vector<1x64xf32> to vector<16x64xf32>
    %30 = arith.mulf %27, %29 : vector<16x64xf32>
    %31 = arith.addf %26, %30 : vector<16x64xf32>
    %32 = vector.extract_strided_slice %1 {offsets = [2, 0], sizes = [16, 64], strides = [1, 1]} : vector<18x72xf32> to vector<16x64xf32>
    %33 = vector.extract_strided_slice %2 {offsets = [6, 0], sizes = [1, 64], strides = [1, 1]} : vector<9x64xf32> to vector<1x64xf32>
    %34 = vector.broadcast %33 : vector<1x64xf32> to vector<16x64xf32>
    %35 = arith.mulf %32, %34 : vector<16x64xf32>
    %36 = arith.addf %31, %35 : vector<16x64xf32>
    %37 = vector.extract_strided_slice %1 {offsets = [2, 4], sizes = [16, 64], strides = [1, 1]} : vector<18x72xf32> to vector<16x64xf32>
    %38 = vector.extract_strided_slice %2 {offsets = [7, 0], sizes = [1, 64], strides = [1, 1]} : vector<9x64xf32> to vector<1x64xf32>
    %39 = vector.broadcast %38 : vector<1x64xf32> to vector<16x64xf32>
    %40 = arith.mulf %37, %39 : vector<16x64xf32>
    %41 = arith.addf %36, %40 : vector<16x64xf32>
    %42 = vector.extract_strided_slice %1 {offsets = [2, 8], sizes = [16, 64], strides = [1, 1]} : vector<18x72xf32> to vector<16x64xf32>
    %43 = vector.extract_strided_slice %2 {offsets = [8, 0], sizes = [1, 64], strides = [1, 1]} : vector<9x64xf32> to vector<1x64xf32>
    %44 = vector.broadcast %43 : vector<1x64xf32> to vector<16x64xf32>
    %45 = arith.mulf %42, %44 : vector<16x64xf32>
    %46 = arith.addf %41, %45 : vector<16x64xf32>
    %c0_4 = arith.constant 0 : index
    %c0_5 = arith.constant 0 : index
    %47 = vector.load %arg4[%c0_4, %c0_5] : memref<18x16xf32, #tpu.memory_space<vmem>>, vector<18x16xf32>
    %cst = arith.constant dense<0.000000e+00> : vector<18x64xf32>
    %48 = tpu.matmul %47, %46, %cst {dimension_numbers = #tpu.dot_dimension_numbers<[1], [0], [0], [1], [0, 0, 1, 1], [], []>} : vector<18x16xf32>, vector<16x64xf32>, vector<18x64xf32> -> vector<18x64xf32>
    %c0_6 = arith.constant 0 : index
    %c0_7 = arith.constant 0 : index
    %49 = vector.load %arg3[%c0_6, %c0_7] : memref<64x72xf32, #tpu.memory_space<vmem>>, vector<64x72xf32>
    %cst_8 = arith.constant dense<0.000000e+00> : vector<18x72xf32>
    %50 = tpu.matmul %48, %49, %cst_8 {dimension_numbers = #tpu.dot_dimension_numbers<[1], [0], [0], [1], [0, 0, 1, 1], [], []>} : vector<18x64xf32>, vector<64x72xf32>, vector<18x72xf32> -> vector<18x72xf32>
    %c0_9 = arith.constant 0 : index
    %c0_10 = arith.constant 0 : index
    %c0_11 = arith.constant 0 : index
    %51 = vector.load %arg5[%c0_9, %c0_10, %c0_11] : memref<1x18x72xf32, #tpu.memory_space<vmem>>, vector<1x18x72xf32>
    %52 = vector.shape_cast %51 : vector<1x18x72xf32> to vector<18x72xf32>
    %53 = vector.shape_cast %50 : vector<18x72xf32> to vector<1x18x72xf32>
    tpu.vector_store %arg5[%c0_9, %c0_10, %c0_11], %53 {strides = array<i32>} : memref<1x18x72xf32, #tpu.memory_space<vmem>>, vector<1x18x72xf32>,
    %54 = vector.extract_strided_slice %50 {offsets = [1, 0], sizes = [16, 72], strides = [1, 1]} : vector<18x72xf32> to vector<16x72xf32>
    %cst_12 = arith.constant dense<0.000000e+00> : vector<72xf32>
    %55 = vector.multi_reduction <add>, %54, %cst_12 [0] : vector<16x72xf32> to vector<72xf32>
    %56 = vector.shape_cast %55 : vector<72xf32> to vector<1x72xf32>
    %cst_13 = arith.constant 6.250000e-02 : f32
    %57 = vector.broadcast %cst_13 : f32 to vector<1x72xf32>
    %58 = arith.mulf %56, %57 : vector<1x72xf32>
    %59 = vector.broadcast %58 : vector<1x72xf32> to vector<16x72xf32>
    %60 = arith.subf %54, %59 : vector<16x72xf32>
    %c0_14 = arith.constant 0 : index
    %c0_15 = arith.constant 0 : index
    %c0_16 = arith.constant 0 : index
    %61 = vector.load %arg6[%c0_14, %c0_15, %c0_16] : memref<1x1x72xf32, #tpu.memory_space<vmem>>, vector<1x1x72xf32>
    %62 = vector.shape_cast %61 : vector<1x1x72xf32> to vector<1x72xf32>
    %63 = vector.shape_cast %56 : vector<1x72xf32> to vector<1x1x72xf32>
    tpu.vector_store %arg6[%c0_14, %c0_15, %c0_16], %63 {strides = array<i32>} : memref<1x1x72xf32, #tpu.memory_space<vmem>>, vector<1x1x72xf32>,
    %64 = arith.mulf %60, %60 : vector<16x72xf32>
    %cst_17 = arith.constant dense<0.000000e+00> : vector<72xf32>
    %65 = vector.multi_reduction <add>, %64, %cst_17 [0] : vector<16x72xf32> to vector<72xf32>
    %66 = vector.shape_cast %65 : vector<72xf32> to vector<1x72xf32>
    %c0_18 = arith.constant 0 : index
    %c0_19 = arith.constant 0 : index
    %c0_20 = arith.constant 0 : index
    %67 = vector.load %arg7[%c0_18, %c0_19, %c0_20] : memref<1x1x72xf32, #tpu.memory_space<vmem>>, vector<1x1x72xf32>
    %68 = vector.shape_cast %67 : vector<1x1x72xf32> to vector<1x72xf32>
    %69 = vector.shape_cast %66 : vector<1x72xf32> to vector<1x1x72xf32>
    tpu.vector_store %arg7[%c0_18, %c0_19, %c0_20], %69 {strides = array<i32>} : memref<1x1x72xf32, #tpu.memory_space<vmem>>, vector<1x1x72xf32>,
    return
  }
  func.func @transform_0(%arg0: i32) -> (i32, i32, i32) {
    %c0_i32 = arith.constant 0 : i32
    %c0_i32_0 = arith.constant 0 : i32
    %c0_i32_1 = arith.constant 0 : i32
    return %arg0, %c0_i32, %c0_i32_0 : i32, i32, i32
  }
  func.func @transform_1(%arg0: i32) -> (i32, i32) {
    %c0_i32 = arith.constant 0 : i32
    %c0_i32_0 = arith.constant 0 : i32
    %c0_i32_1 = arith.constant 0 : i32
    return %c0_i32, %c0_i32_0 : i32, i32
  }
  func.func @transform_2(%arg0: i32) -> (i32, i32) {
    %c0_i32 = arith.constant 0 : i32
    %c0_i32_0 = arith.constant 0 : i32
    %c0_i32_1 = arith.constant 0 : i32
    return %c0_i32, %c0_i32_0 : i32, i32
  }
  func.func @transform_3(%arg0: i32) -> (i32, i32) {
    %c0_i32 = arith.constant 0 : i32
    %c0_i32_0 = arith.constant 0 : i32
    %c0_i32_1 = arith.constant 0 : i32
    return %c0_i32, %c0_i32_0 : i32, i32
  }
  func.func @transform_4(%arg0: i32) -> (i32, i32, i32) {
    %c0_i32 = arith.constant 0 : i32
    %c0_i32_0 = arith.constant 0 : i32
    %c0_i32_1 = arith.constant 0 : i32
    return %arg0, %c0_i32, %c0_i32_0 : i32, i32, i32
  }
  func.func @transform_5(%arg0: i32) -> (i32, i32, i32) {
    %c0_i32 = arith.constant 0 : i32
    %c0_i32_0 = arith.constant 0 : i32
    %c0_i32_1 = arith.constant 0 : i32
    return %arg0, %c0_i32, %c0_i32_0 : i32, i32, i32
  }
  func.func @transform_6(%arg0: i32) -> (i32, i32, i32) {
    %c0_i32 = arith.constant 0 : i32
    %c0_i32_0 = arith.constant 0 : i32
    %c0_i32_1 = arith.constant 0 : i32
    return %arg0, %c0_i32, %c0_i32_0 : i32, i32, i32
  }
}

module attributes {stable_mosaic.version = 11 : i64} {
  func.func @kernel(%arg0: i32, %arg1: memref<1x18x72xf32, #tpu.memory_space<vmem>>, %arg2: memref<1x72xf32, #tpu.memory_space<vmem>>, %arg3: memref<1x72xf32, #tpu.memory_space<vmem>>, %arg4: memref<9x64xf32, #tpu.memory_space<vmem>>, %arg5: memref<64x128xf32, #tpu.memory_space<vmem>>, %arg6: memref<1x16x128xf32, #tpu.memory_space<vmem>>, %arg7: memref<1x1x128xf32, #tpu.memory_space<vmem>>, %arg8: memref<1x1x128xf32, #tpu.memory_space<vmem>>) attributes {dimension_semantics = [#tpu.dimension_semantics<parallel>], iteration_bounds = array<i64: 2>, scalar_prefetch = 0 : i64, scratch_operands = 0 : i64, tpu.core_type = #tpu.core_type<tc>, window_params = [{transform_indices = @transform_0, window_bounds = array<i64: 1, 18, 72>}, {pipeline_mode = #tpu.pipeline_mode<synchronous>, transform_indices = @transform_1, window_bounds = array<i64: 1, 72>}, {pipeline_mode = #tpu.pipeline_mode<synchronous>, transform_indices = @transform_2, window_bounds = array<i64: 1, 72>}, {pipeline_mode = #tpu.pipeline_mode<synchronous>, transform_indices = @transform_3, window_bounds = array<i64: 9, 64>}, {pipeline_mode = #tpu.pipeline_mode<synchronous>, transform_indices = @transform_4, window_bounds = array<i64: 64, 128>}, {transform_indices = @transform_5, window_bounds = array<i64: 1, 16, 128>}, {transform_indices = @transform_6, window_bounds = array<i64: 1, 1, 128>}, {transform_indices = @transform_7, window_bounds = array<i64: 1, 1, 128>}]} {
    %c0 = arith.constant 0 : index
    %c0_0 = arith.constant 0 : index
    %c0_1 = arith.constant 0 : index
    %0 = vector.load %arg1[%c0, %c0_0, %c0_1] : memref<1x18x72xf32, #tpu.memory_space<vmem>>, vector<1x18x72xf32>
    %1 = vector.shape_cast %0 : vector<1x18x72xf32> to vector<18x72xf32>
    %c0_2 = arith.constant 0 : index
    %c0_3 = arith.constant 0 : index
    %2 = vector.load %arg2[%c0_2, %c0_3] : memref<1x72xf32, #tpu.memory_space<vmem>>, vector<1x72xf32>
    %3 = vector.broadcast %2 : vector<1x72xf32> to vector<18x72xf32>
    %4 = arith.subf %1, %3 : vector<18x72xf32>
    %c0_4 = arith.constant 0 : index
    %c0_5 = arith.constant 0 : index
    %5 = vector.load %arg3[%c0_4, %c0_5] : memref<1x72xf32, #tpu.memory_space<vmem>>, vector<1x72xf32>
    %6 = vector.broadcast %5 : vector<1x72xf32> to vector<18x72xf32>
    %7 = arith.mulf %4, %6 : vector<18x72xf32>
    %cst = arith.constant 0.000000e+00 : f32
    %8 = vector.broadcast %cst : f32 to vector<18x72xf32>
    %9 = arith.maximumf %7, %8 : vector<18x72xf32>
    %10 = tpu.iota {dimensions = array<i32: 0>} : vector<18x72xi32>
    %11 = tpu.iota {dimensions = array<i32: 1>} : vector<18x72xi32>
    %c1_i32 = arith.constant 1 : i32
    %12 = vector.broadcast %c1_i32 : i32 to vector<18x72xi32>
    %13 = arith.cmpi sge, %10, %12 : vector<18x72xi32>
    %c17_i32 = arith.constant 17 : i32
    %14 = vector.broadcast %c17_i32 : i32 to vector<18x72xi32>
    %15 = arith.cmpi slt, %10, %14 : vector<18x72xi32>
    %16 = arith.andi %13, %15 : vector<18x72xi1>
    %c4_i32 = arith.constant 4 : i32
    %17 = vector.broadcast %c4_i32 : i32 to vector<18x72xi32>
    %18 = arith.cmpi sge, %11, %17 : vector<18x72xi32>
    %19 = arith.andi %16, %18 : vector<18x72xi1>
    %c68_i32 = arith.constant 68 : i32
    %20 = vector.broadcast %c68_i32 : i32 to vector<18x72xi32>
    %21 = arith.cmpi slt, %11, %20 : vector<18x72xi32>
    %22 = arith.andi %19, %21 : vector<18x72xi1>
    %cst_6 = arith.constant 0.000000e+00 : f32
    %23 = vector.broadcast %cst_6 : f32 to vector<18x72xf32>
    %24 = arith.select %22, %9, %23 : vector<18x72xi1>, vector<18x72xf32>
    %c0_7 = arith.constant 0 : index
    %c0_8 = arith.constant 0 : index
    %25 = vector.load %arg4[%c0_7, %c0_8] : memref<9x64xf32, #tpu.memory_space<vmem>>, vector<9x64xf32>
    %26 = vector.extract_strided_slice %24 {offsets = [0, 0], sizes = [16, 64], strides = [1, 1]} : vector<18x72xf32> to vector<16x64xf32>
    %27 = vector.extract_strided_slice %25 {offsets = [0, 0], sizes = [1, 64], strides = [1, 1]} : vector<9x64xf32> to vector<1x64xf32>
    %28 = vector.broadcast %27 : vector<1x64xf32> to vector<16x64xf32>
    %29 = arith.mulf %26, %28 : vector<16x64xf32>
    %30 = vector.extract_strided_slice %24 {offsets = [0, 4], sizes = [16, 64], strides = [1, 1]} : vector<18x72xf32> to vector<16x64xf32>
    %31 = vector.extract_strided_slice %25 {offsets = [1, 0], sizes = [1, 64], strides = [1, 1]} : vector<9x64xf32> to vector<1x64xf32>
    %32 = vector.broadcast %31 : vector<1x64xf32> to vector<16x64xf32>
    %33 = arith.mulf %30, %32 : vector<16x64xf32>
    %34 = arith.addf %29, %33 : vector<16x64xf32>
    %35 = vector.extract_strided_slice %24 {offsets = [0, 8], sizes = [16, 64], strides = [1, 1]} : vector<18x72xf32> to vector<16x64xf32>
    %36 = vector.extract_strided_slice %25 {offsets = [2, 0], sizes = [1, 64], strides = [1, 1]} : vector<9x64xf32> to vector<1x64xf32>
    %37 = vector.broadcast %36 : vector<1x64xf32> to vector<16x64xf32>
    %38 = arith.mulf %35, %37 : vector<16x64xf32>
    %39 = arith.addf %34, %38 : vector<16x64xf32>
    %40 = vector.extract_strided_slice %24 {offsets = [1, 0], sizes = [16, 64], strides = [1, 1]} : vector<18x72xf32> to vector<16x64xf32>
    %41 = vector.extract_strided_slice %25 {offsets = [3, 0], sizes = [1, 64], strides = [1, 1]} : vector<9x64xf32> to vector<1x64xf32>
    %42 = vector.broadcast %41 : vector<1x64xf32> to vector<16x64xf32>
    %43 = arith.mulf %40, %42 : vector<16x64xf32>
    %44 = arith.addf %39, %43 : vector<16x64xf32>
    %45 = vector.extract_strided_slice %24 {offsets = [1, 4], sizes = [16, 64], strides = [1, 1]} : vector<18x72xf32> to vector<16x64xf32>
    %46 = vector.extract_strided_slice %25 {offsets = [4, 0], sizes = [1, 64], strides = [1, 1]} : vector<9x64xf32> to vector<1x64xf32>
    %47 = vector.broadcast %46 : vector<1x64xf32> to vector<16x64xf32>
    %48 = arith.mulf %45, %47 : vector<16x64xf32>
    %49 = arith.addf %44, %48 : vector<16x64xf32>
    %50 = vector.extract_strided_slice %24 {offsets = [1, 8], sizes = [16, 64], strides = [1, 1]} : vector<18x72xf32> to vector<16x64xf32>
    %51 = vector.extract_strided_slice %25 {offsets = [5, 0], sizes = [1, 64], strides = [1, 1]} : vector<9x64xf32> to vector<1x64xf32>
    %52 = vector.broadcast %51 : vector<1x64xf32> to vector<16x64xf32>
    %53 = arith.mulf %50, %52 : vector<16x64xf32>
    %54 = arith.addf %49, %53 : vector<16x64xf32>
    %55 = vector.extract_strided_slice %24 {offsets = [2, 0], sizes = [16, 64], strides = [1, 1]} : vector<18x72xf32> to vector<16x64xf32>
    %56 = vector.extract_strided_slice %25 {offsets = [6, 0], sizes = [1, 64], strides = [1, 1]} : vector<9x64xf32> to vector<1x64xf32>
    %57 = vector.broadcast %56 : vector<1x64xf32> to vector<16x64xf32>
    %58 = arith.mulf %55, %57 : vector<16x64xf32>
    %59 = arith.addf %54, %58 : vector<16x64xf32>
    %60 = vector.extract_strided_slice %24 {offsets = [2, 4], sizes = [16, 64], strides = [1, 1]} : vector<18x72xf32> to vector<16x64xf32>
    %61 = vector.extract_strided_slice %25 {offsets = [7, 0], sizes = [1, 64], strides = [1, 1]} : vector<9x64xf32> to vector<1x64xf32>
    %62 = vector.broadcast %61 : vector<1x64xf32> to vector<16x64xf32>
    %63 = arith.mulf %60, %62 : vector<16x64xf32>
    %64 = arith.addf %59, %63 : vector<16x64xf32>
    %65 = vector.extract_strided_slice %24 {offsets = [2, 8], sizes = [16, 64], strides = [1, 1]} : vector<18x72xf32> to vector<16x64xf32>
    %66 = vector.extract_strided_slice %25 {offsets = [8, 0], sizes = [1, 64], strides = [1, 1]} : vector<9x64xf32> to vector<1x64xf32>
    %67 = vector.broadcast %66 : vector<1x64xf32> to vector<16x64xf32>
    %68 = arith.mulf %65, %67 : vector<16x64xf32>
    %69 = arith.addf %64, %68 : vector<16x64xf32>
    %c0_9 = arith.constant 0 : index
    %c0_10 = arith.constant 0 : index
    %70 = vector.load %arg5[%c0_9, %c0_10] : memref<64x128xf32, #tpu.memory_space<vmem>>, vector<64x128xf32>
    %cst_11 = arith.constant dense<0.000000e+00> : vector<16x128xf32>
    %71 = tpu.matmul %69, %70, %cst_11 {dimension_numbers = #tpu.dot_dimension_numbers<[1], [0], [0], [1], [0, 0, 1, 1], [], []>} : vector<16x64xf32>, vector<64x128xf32>, vector<16x128xf32> -> vector<16x128xf32>
    %c0_12 = arith.constant 0 : index
    %c0_13 = arith.constant 0 : index
    %c0_14 = arith.constant 0 : index
    %72 = vector.load %arg6[%c0_12, %c0_13, %c0_14] : memref<1x16x128xf32, #tpu.memory_space<vmem>>, vector<1x16x128xf32>
    %73 = vector.shape_cast %72 : vector<1x16x128xf32> to vector<16x128xf32>
    %74 = vector.shape_cast %71 : vector<16x128xf32> to vector<1x16x128xf32>
    tpu.vector_store %arg6[%c0_12, %c0_13, %c0_14], %74 {strides = array<i32>} : memref<1x16x128xf32, #tpu.memory_space<vmem>>, vector<1x16x128xf32>,
    %cst_15 = arith.constant dense<0.000000e+00> : vector<128xf32>
    %75 = vector.multi_reduction <add>, %71, %cst_15 [0] : vector<16x128xf32> to vector<128xf32>
    %76 = vector.shape_cast %75 : vector<128xf32> to vector<1x128xf32>
    %cst_16 = arith.constant 6.250000e-02 : f32
    %77 = vector.broadcast %cst_16 : f32 to vector<1x128xf32>
    %78 = arith.mulf %76, %77 : vector<1x128xf32>
    %79 = vector.broadcast %78 : vector<1x128xf32> to vector<16x128xf32>
    %80 = arith.subf %71, %79 : vector<16x128xf32>
    %c0_17 = arith.constant 0 : index
    %c0_18 = arith.constant 0 : index
    %c0_19 = arith.constant 0 : index
    %81 = vector.load %arg7[%c0_17, %c0_18, %c0_19] : memref<1x1x128xf32, #tpu.memory_space<vmem>>, vector<1x1x128xf32>
    %82 = vector.shape_cast %81 : vector<1x1x128xf32> to vector<1x128xf32>
    %83 = vector.shape_cast %76 : vector<1x128xf32> to vector<1x1x128xf32>
    tpu.vector_store %arg7[%c0_17, %c0_18, %c0_19], %83 {strides = array<i32>} : memref<1x1x128xf32, #tpu.memory_space<vmem>>, vector<1x1x128xf32>,
    %84 = arith.mulf %80, %80 : vector<16x128xf32>
    %cst_20 = arith.constant dense<0.000000e+00> : vector<128xf32>
    %85 = vector.multi_reduction <add>, %84, %cst_20 [0] : vector<16x128xf32> to vector<128xf32>
    %86 = vector.shape_cast %85 : vector<128xf32> to vector<1x128xf32>
    %c0_21 = arith.constant 0 : index
    %c0_22 = arith.constant 0 : index
    %c0_23 = arith.constant 0 : index
    %87 = vector.load %arg8[%c0_21, %c0_22, %c0_23] : memref<1x1x128xf32, #tpu.memory_space<vmem>>, vector<1x1x128xf32>
    %88 = vector.shape_cast %87 : vector<1x1x128xf32> to vector<1x128xf32>
    %89 = vector.shape_cast %86 : vector<1x128xf32> to vector<1x1x128xf32>
    tpu.vector_store %arg8[%c0_21, %c0_22, %c0_23], %89 {strides = array<i32>} : memref<1x1x128xf32, #tpu.memory_space<vmem>>, vector<1x1x128xf32>,
    return
  }
  func.func @transform_0(%arg0: i32) -> (i32, i32, i32) {
    %c0_i32 = arith.constant 0 : i32
    %c0_i32_0 = arith.constant 0 : i32
    %c0_i32_1 = arith.constant 0 : i32
    return %arg0, %c0_i32, %c0_i32_0 : i32, i32, i32
  }
  func.func @transform_1(%arg0: i32) -> (i32, i32) {
    %c0_i32 = arith.constant 0 : i32
    %c0_i32_0 = arith.constant 0 : i32
    %c0_i32_1 = arith.constant 0 : i32
    return %c0_i32, %c0_i32_0 : i32, i32
  }
  func.func @transform_2(%arg0: i32) -> (i32, i32) {
    %c0_i32 = arith.constant 0 : i32
    %c0_i32_0 = arith.constant 0 : i32
    %c0_i32_1 = arith.constant 0 : i32
    return %c0_i32, %c0_i32_0 : i32, i32
  }
  func.func @transform_3(%arg0: i32) -> (i32, i32) {
    %c0_i32 = arith.constant 0 : i32
    %c0_i32_0 = arith.constant 0 : i32
    %c0_i32_1 = arith.constant 0 : i32
    return %c0_i32, %c0_i32_0 : i32, i32
  }
  func.func @transform_4(%arg0: i32) -> (i32, i32) {
    %c0_i32 = arith.constant 0 : i32
    %c0_i32_0 = arith.constant 0 : i32
    %c0_i32_1 = arith.constant 0 : i32
    return %c0_i32, %c0_i32_0 : i32, i32
  }
  func.func @transform_5(%arg0: i32) -> (i32, i32, i32) {
    %c0_i32 = arith.constant 0 : i32
    %c0_i32_0 = arith.constant 0 : i32
    %c0_i32_1 = arith.constant 0 : i32
    return %arg0, %c0_i32, %c0_i32_0 : i32, i32, i32
  }
  func.func @transform_6(%arg0: i32) -> (i32, i32, i32) {
    %c0_i32 = arith.constant 0 : i32
    %c0_i32_0 = arith.constant 0 : i32
    %c0_i32_1 = arith.constant 0 : i32
    return %arg0, %c0_i32, %c0_i32_0 : i32, i32, i32
  }
  func.func @transform_7(%arg0: i32) -> (i32, i32, i32) {
    %c0_i32 = arith.constant 0 : i32
    %c0_i32_0 = arith.constant 0 : i32
    %c0_i32_1 = arith.constant 0 : i32
    return %arg0, %c0_i32, %c0_i32_0 : i32, i32, i32
  }
}

module attributes {stable_mosaic.version = 11 : i64} {
  func.func @_bn_relu_kernel(%arg0: i32, %arg1: memref<8x128xf32, #tpu.memory_space<vmem>>, %arg2: memref<1x128xf32, #tpu.memory_space<vmem>>, %arg3: memref<1x128xf32, #tpu.memory_space<vmem>>, %arg4: memref<8x128xf32, #tpu.memory_space<vmem>>) attributes {dimension_semantics = [#tpu.dimension_semantics<parallel>], iteration_bounds = array<i64: 4>, scalar_prefetch = 0 : i64, scratch_operands = 0 : i64, tpu.core_type = #tpu.core_type<tc>, window_params = [{transform_indices = @transform_0, window_bounds = array<i64: 8, 128>}, {pipeline_mode = #tpu.pipeline_mode<synchronous>, transform_indices = @transform_1, window_bounds = array<i64: 1, 128>}, {pipeline_mode = #tpu.pipeline_mode<synchronous>, transform_indices = @transform_2, window_bounds = array<i64: 1, 128>}, {transform_indices = @transform_3, window_bounds = array<i64: 8, 128>}]} {
    %c0 = arith.constant 0 : index
    %c0_0 = arith.constant 0 : index
    %0 = vector.load %arg1[%c0, %c0_0] : memref<8x128xf32, #tpu.memory_space<vmem>>, vector<8x128xf32>
    %c0_1 = arith.constant 0 : index
    %c0_2 = arith.constant 0 : index
    %1 = vector.load %arg2[%c0_1, %c0_2] : memref<1x128xf32, #tpu.memory_space<vmem>>, vector<1x128xf32>
    %2 = vector.broadcast %1 : vector<1x128xf32> to vector<8x128xf32>
    %3 = arith.subf %0, %2 : vector<8x128xf32>
    %c0_3 = arith.constant 0 : index
    %c0_4 = arith.constant 0 : index
    %4 = vector.load %arg3[%c0_3, %c0_4] : memref<1x128xf32, #tpu.memory_space<vmem>>, vector<1x128xf32>
    %5 = vector.broadcast %4 : vector<1x128xf32> to vector<8x128xf32>
    %6 = arith.mulf %3, %5 : vector<8x128xf32>
    %cst = arith.constant 0.000000e+00 : f32
    %7 = vector.broadcast %cst : f32 to vector<8x128xf32>
    %8 = arith.maximumf %6, %7 : vector<8x128xf32>
    %c0_5 = arith.constant 0 : index
    %c0_6 = arith.constant 0 : index
    %9 = vector.load %arg4[%c0_5, %c0_6] : memref<8x128xf32, #tpu.memory_space<vmem>>, vector<8x128xf32>
    tpu.vector_store %arg4[%c0_5, %c0_6], %8 {strides = array<i32>} : memref<8x128xf32, #tpu.memory_space<vmem>>, vector<8x128xf32>,
    return
  }
  func.func @transform_0(%arg0: i32) -> (i32, i32) {
    %c0_i32 = arith.constant 0 : i32
    %c0_i32_0 = arith.constant 0 : i32
    return %arg0, %c0_i32 : i32, i32
  }
  func.func @transform_1(%arg0: i32) -> (i32, i32) {
    %c0_i32 = arith.constant 0 : i32
    %c0_i32_0 = arith.constant 0 : i32
    %c0_i32_1 = arith.constant 0 : i32
    return %c0_i32, %c0_i32_0 : i32, i32
  }
  func.func @transform_2(%arg0: i32) -> (i32, i32) {
    %c0_i32 = arith.constant 0 : i32
    %c0_i32_0 = arith.constant 0 : i32
    %c0_i32_1 = arith.constant 0 : i32
    return %c0_i32, %c0_i32_0 : i32, i32
  }
  func.func @transform_3(%arg0: i32) -> (i32, i32) {
    %c0_i32 = arith.constant 0 : i32
    %c0_i32_0 = arith.constant 0 : i32
    return %arg0, %c0_i32 : i32, i32
  }
}

</mosaic_0001>

<bundles_post_ra>
// kernel: tile.40
= control target key start
LH: loop header
LB: loop body
LE: loop exit
PB: predicated region body
PF: predicated region fallthrough
CT: control target
= control target key end

     0   :  { %s34_s0 = inlined_call_operand.vmem [shape: f32[4], index: 0, kind: input, shape index: {}]   ;;  %s35_s1 = inlined_call_operand.vmem [shape: f32[18,4], index: 1, kind: output, shape index: {}]  }
   0x1   :  { %v4_v0 = vld [vmem:[%s34_s0] ss:$0 sm:$0xff] }
   0x2   :  { %5 = vst [vmem:[%s35_s1] sm:$0xff] %v4_v0  ;;  %10 = vst [vmem:[%s35_s1 + $0x8] sm:$0xff] %v4_v0 }
   0x3   :  { %11 = vst [vmem:[%s35_s1 + $0x10] sm:$0xff] %v4_v0 }

// kernel: tile.41
= control target key start
LH: loop header
LB: loop body
LE: loop exit
PB: predicated region body
PF: predicated region fallthrough
CT: control target
= control target key end

     0   :  { %s147_s10 = smov 68   ;;  %s148_s11 = smov 60   ;;  %vm3_vm0 = vcmask 31744   ;;  %vm9_vm1 = vcmask 589344   ;;  %vm15_vm2 = vcmask 556544   ;;  %vm21_vm3 = vcmask 523744   ;;  %s231_s0 = inlined_call_operand.vmem [shape: f32[18,4], index: 0, kind: input, shape index: {}]   ;;  %s232_s1 = inlined_call_operand.vmem [shape: f32[1,72], index: 1, kind: output, shape index: {}]  }
   0x1   :  { %v113_v0 = vld [vmem:[%s231_s0 + $0x11] sm:$0x1]   ;;  %v115_v1 = vld [vmem:[%s231_s0 + $0xf] sm:$0x1]   ;;  %v114_v2 = vld [vmem:[%s231_s0 + $0x10] sm:$0x1]  }
   0x2   :  { %7 = vrot.lane.b32.xlu0 %v113_v0, %s147_s10  ;;  %19 = vrot.lane.b32.xlu1 %v115_v1, %s148_s11  ;;  %v116_v3 = vld [vmem:[%s231_s0 + $0xe] sm:$0x1]   ;;  %s149_s16 = smov 64   ;;  %s150_s17 = smov 56   ;;  %v117_v4 = vld [vmem:[%s231_s0 + $0xd] sm:$0x1]  }
   0x3   :  { %v118_v5 = vld [vmem:[%s231_s0 + $0xc] sm:$0x1]   ;;  %v2_v6 = vld [vmem:[%s231_s0] sm:$0x1]   ;;  %s151_s24 = smov 52   ;;  %s152_s25 = smov 48  }
   0x4   :  { %v119_v7 = vld [vmem:[%s231_s0 + $0xb] sm:$0x1]   ;;  %v120_v8 = vld [vmem:[%s231_s0 + $0xa] sm:$0x1]   ;;  %4 = vst.msk [vmem:[#allocation0] sm:$0x1] %vm3_vm0, %v2_v6  }
   0x5   :  { %s153_s30 = smov 44   ;;  %s154_s2 = smov 40   ;;  %v121_v9 = vld [vmem:[%s231_s0 + $0x9] sm:$0x1]   ;;  %v122_v10 = vld [vmem:[%s231_s0 + $0x8] sm:$0x1]  }
   0x6   :  { %13 = vrot.lane.b32.xlu0 %v114_v2, %s149_s16  ;;  %25 = vrot.lane.b32.xlu1 %v116_v3, %s150_s17  ;;  %s155_s7 = smov 36   ;;  %s156_s8 = smov 32   ;;  %v123_v11 = vld [vmem:[%s231_s0 + $0x7] sm:$0x1]   ;;  %v124_v12 = vld [vmem:[%s231_s0 + $0x6] sm:$0x1]  }
   0x7   :  { %s157_s13 = smov 28   ;;  %s158_s14 = smov 24   ;;  %v125_v13 = vld [vmem:[%s231_s0 + $0x5] sm:$0x1]   ;;  %v126_v14 = vld [vmem:[%s231_s0 + $0x4] sm:$0x1]  }
   0x8   :  { %s159_s19 = smov 20   ;;  %s160_s20 = smov 16   ;;  %v127_v15 = vld [vmem:[%s231_s0 + $0x3] sm:$0x1]   ;;  %v128_v16 = vld [vmem:[%s231_s0 + $0x2] sm:$0x1]  }
   0x9   :  { %s162_s26 = smov 8   ;;  %v129_v17 = vld [vmem:[%s231_s0 + $0x1] sm:$0x1]   ;;  %s163_s0 = smov 4   ;;  %vm27_vm4 = vcmask 490944   ;;  %vm33_vm5 = vcmask 458144  }
   0xa   :  { %31 = vrot.lane.b32.xlu0 %v117_v4, %s151_s24  ;;  %37 = vrot.lane.b32.xlu1 %v118_v5, %s152_s25  ;;  %s161_s25 = smov 12   ;;  %vm39_vm6 = vcmask 425344   ;;  %vm45_vm7 = vcmask 392544   ;;  %vm51_vm8 = vcmask 359744   ;;  %vm57_vm9 = vcmask 326944  }
   0xb   :  { %vm63_vm10 = vcmask 294144   ;;  %vm69_vm11 = vcmask 261344   ;;  %vm75_vm12 = vcmask 228544   ;;  %vm81_vm13 = vcmask 195744  }
   0xc   :  { %vm87_vm14 = vcmask 162944   ;;  %vm93_vm15 = vcmask 130144   ;;  %vm99_vm0 = vcmask 97344  }
   0xe   :  { %43 = vrot.lane.b32.xlu0 %v119_v7, %s153_s30  ;;  %49 = vrot.lane.b32.xlu1 %v120_v8, %s154_s2 }
  0x12   :  { %55 = vrot.lane.b32.xlu0 %v121_v9, %s155_s7  ;;  %61 = vrot.lane.b32.xlu1 %v122_v10, %s156_s8 }
  0x16   :  { %67 = vrot.lane.b32.xlu0 %v123_v11, %s157_s13  ;;  %73 = vrot.lane.b32.xlu1 %v124_v12, %s158_s14 }
  0x1a   :  { %79 = vrot.lane.b32.xlu0 %v125_v13, %s159_s19  ;;  %85 = vrot.lane.b32.xlu1 %v126_v14, %s160_s20 }
  0x1e   :  { %91 = vrot.lane.b32.xlu0 %v127_v15, %s161_s25  ;;  %97 = vrot.lane.b32.xlu1 %v128_v16, %s162_s26 }
  0x22   :  { %103 = vrot.lane.b32.xlu0 %v129_v17, %s163_s0 }
  0x74   :  { %v8_v18 = vpop.permute.xlu0 %7   ;;  %v20_v19 = vpop.permute.xlu1 %19  }
  0x75   :  { %10 = vst.msk [vmem:[#allocation0] sm:$0x1] %vm9_vm1, %v8_v18   ;;  %vm105_vm1 = vcmask 64544  }
  0x78   :  { %v14_v20 = vpop.permute.xlu0 %13   ;;  %v26_v21 = vpop.permute.xlu1 %25  }
  0x79   :  { %16 = vst.msk [vmem:[#allocation0] sm:$0x1] %vm15_vm2, %v14_v20  }
  0x7a   :  { %22 = vst.msk [vmem:[#allocation0] sm:$0x1] %vm21_vm3, %v20_v19  }
  0x7b   :  { %28 = vst.msk [vmem:[#allocation0] sm:$0x1] %vm27_vm4, %v26_v21  }
  0x7c   :  { %v32_v22 = vpop.permute.xlu0 %31   ;;  %v38_v23 = vpop.permute.xlu1 %37  }
  0x7d   :  { %34 = vst.msk [vmem:[#allocation0] sm:$0x1] %vm33_vm5, %v32_v22  }
  0x7e   :  { %40 = vst.msk [vmem:[#allocation0] sm:$0x1] %vm39_vm6, %v38_v23  }
  0x80   :  { %v44_v24 = vpop.permute.xlu0 %43   ;;  %v50_v25 = vpop.permute.xlu1 %49  }
  0x81   :  { %46 = vst.msk [vmem:[#allocation0] sm:$0x1] %vm45_vm7, %v44_v24  }
  0x82   :  { %52 = vst.msk [vmem:[#allocation0] sm:$0x1] %vm51_vm8, %v50_v25  }
  0x84   :  { %v56_v26 = vpop.permute.xlu0 %55   ;;  %v62_v27 = vpop.permute.xlu1 %61  }
  0x85   :  { %58 = vst.msk [vmem:[#allocation0] sm:$0x1] %vm57_vm9, %v56_v26  }
  0x86   :  { %64 = vst.msk [vmem:[#allocation0] sm:$0x1] %vm63_vm10, %v62_v27  }
  0x88   :  { %v68_v28 = vpop.permute.xlu0 %67   ;;  %v74_v29 = vpop.permute.xlu1 %73  }
  0x89   :  { %70 = vst.msk [vmem:[#allocation0] sm:$0x1] %vm69_vm11, %v68_v28  }
  0x8a   :  { %76 = vst.msk [vmem:[#allocation0] sm:$0x1] %vm75_vm12, %v74_v29  }
  0x8c   :  { %v80_v30 = vpop.permute.xlu0 %79   ;;  %v86_v31 = vpop.permute.xlu1 %85  }
  0x8d   :  { %82 = vst.msk [vmem:[#allocation0] sm:$0x1] %vm81_vm13, %v80_v30  }
  0x8e   :  { %88 = vst.msk [vmem:[#allocation0] sm:$0x1] %vm87_vm14, %v86_v31  }
  0x90   :  { %v92_v32 = vpop.permute.xlu0 %91   ;;  %v98_v33 = vpop.permute.xlu1 %97  }
  0x91   :  { %94 = vst.msk [vmem:[#allocation0] sm:$0x1] %vm93_vm15, %v92_v32  }
  0x92   :  { %100 = vst.msk [vmem:[#allocation0] sm:$0x1] %vm99_vm0, %v98_v33  }
  0x94   :  { %v104_v34 = vpop.permute.xlu0 %103  }
  0x95   :  { %106 = vst.msk [vmem:[#allocation0] sm:$0x1] %vm105_vm1, %v104_v34  }
  0x9c   :  { %v110_v35 = vld [vmem:[#allocation0] sm:$0x1] }
  0x9d   :  { %112 = vst [vmem:[%s232_s1] sm:$0x1] %v110_v35 }

// kernel: sep_conv_forward.3
= control target key start
LH: loop header
LB: loop body
LE: loop exit
PB: predicated region body
PF: predicated region fallthrough
CT: control target
= control target key end

     0   :  { %s976_s21 = smov 0   ;;  %s1166_s0 = inlined_call_operand.vmem [shape: f32[2,18,72], index: 0, kind: input, shape index: {}]   ;;  %s1167_s1 = inlined_call_operand.vmem [shape: f32[9,64], index: 1, kind: input, shape index: {}]   ;;  %s1168_s2 = inlined_call_operand.vmem [shape: f32[64,72], index: 2, kind: input, shape index: {}]   ;;  %s1169_s3 = inlined_call_operand.vmem [shape: f32[18,16], index: 3, kind: input, shape index: {}]   ;;  %s1170_s4 = inlined_call_operand.vmem [shape: f32[2,18,72], index: 4, kind: output, shape index: {0}]   ;;  %s1171_s5 = inlined_call_operand.vmem [shape: f32[2,1,72], index: 5, kind: output, shape index: {1}]   ;;  %s1172_s6 = inlined_call_operand.vmem [shape: f32[2,1,72], index: 6, kind: output, shape index: {2}]  }
   0x1 LB: > { %s817_s22 = sadd.s32 4294967295, %s932_s21   ;;  %p821_p0 = scmp.ge.s32.totalorder %s932_s21, 1  ;;  %s932_s21 = sphi %s976_s21, %s17_s21  }
   0x2   : > { %p217_p1 = scmp.lt.s32.totalorder %s932_s21, 3 }
   0x4   : > { %p218_p2 = pnand %p821_p0, %p217_p1 }
   0x5   : > { %v274_v0 = vlaneseq (!%p218_p2)  ;;  %v989_v2 = vld [vmem:[%s1167_s1] sm:$0xff] (!%p218_p2)  ;;  %s934_s25 = smov (!%p218_p2), 4   ;;  %s935_s26 = smov (!%p218_p2), 8   ;;  %v824_v13 = vld [vmem:[%s1167_s1 + $0x8] ss:$0 sm:$0xff] (!%p218_p2)  ;;  %vm330_vm0 = vcmask (!%p218_p2), 1046528  }
   0x6   : > { %221 = sbr.rel (%p218_p2) target bundleno = 747 (0x2eb), region = 36  ;;  %p253_p3 = scmp.lt.s32.totalorder (!%p218_p2), %s817_s22, 1  ;;  %vm404_vm1 = vcmask (!%p218_p2), 1045504   ;;  %vm939_vm2 = vmmov (!%p218_p2), 0   ;;  %vm471_vm3 = vcmask (!%p218_p2), 130048   ;;  %vm569_vm4 = vcmask (!%p218_p2), 523264  }
   0x7   : > { %v984_v1 = vshrl.u32 (!%p218_p2), %v274_v0, 7  ;;  %s936_s9 = smov (!%p218_p2), 124   ;;  %s937_s10 = smov (!%p218_p2), 120   ;;  %vm659_vm5 = vcmask (!%p218_p2), 588800   ;;  %vm662_vm6 = vcmask (!%p218_p2), 582656   ;;  %vm687_vm7 = vcmask (!%p218_p2), 581632  }
   0x9   : > { %v282_v3 = vsub.s32 (!%p218_p2), 1, %v984_v1  ;;  %v302_v4 = vsub.s32 (!%p218_p2), 2, %v984_v1  ;;  %v342_v5 = vsub.s32 (!%p218_p2), 4, %v984_v1  ;;  %v369_v6 = vsub.s32 (!%p218_p2), 5, %v984_v1 }
   0xa   : > { %v416_v11 = vsub.s32 (!%p218_p2), 7, %v984_v1  ;;  %v322_v14 = vsub.s32 (!%p218_p2), 3, %v984_v1  ;;  %v396_v27 = vsub.s32 (!%p218_p2), 6, %v984_v1 }
   0xb   : > { %v283_v7 = vrot.slane (!%p218_p2), %v989_v2, %v282_v3  ;;  %v343_v8 = vrot.slane (!%p218_p2), %v989_v2, %v342_v5  ;;  %v303_v9 = vrot.slane (!%p218_p2), %v989_v2, %v302_v4  ;;  %v370_v10 = vrot.slane (!%p218_p2), %v989_v2, %v369_v6 }
   0xc   : > { %v417_v12 = vrot.slane (!%p218_p2), %v989_v2, %v416_v11  ;;  %v323_v15 = vrot.slane (!%p218_p2), %v989_v2, %v322_v14  ;;  %v397_v28 = vrot.slane (!%p218_p2), %v989_v2, %v396_v27  ;;  %v564_v27 = vld [vmem:[%s1168_s2 + $0x18] sm:$0xff] (!%p218_p2) }
   0xd   : > { %285 = vrot.lane.b32.xlu0 %v283_v7, %s934_s25  ;;  %345 = vrot.lane.b32.xlu1 %v343_v8, %s934_s25  ;;  %s1174_s22 = smov (!%p253_p3, %s817_s22), 1 }
   0xe   : > { %s910_s29 = smul.u32 24, %s1174_s22  ;;  %s265_s16 = scalar_lea.vmem %s1171_s5, %s1174_s22 }
   0xf   : > { %s268_s19 = scalar_lea.vmem %s1172_s6, %s1174_s22 }
  0x10   : > { %s257_s8 = scalar_lea.vmem %s1166_s0, %s910_s29  ;;  %s262_s14 = scalar_lea.vmem %s1170_s4, %s910_s29 }
  0x11   : > { %305 = vrot.lane.b32.xlu0 %v303_v9, %s935_s26  ;;  %372 = vrot.lane.b32.xlu1 %v370_v10, %s935_s26  ;;  %v1014_v16 = vld [vmem:[%s257_s8] sm:$0xff]  ;;  %v1016_v17 = vld [vmem:[%s257_s8 + $0x8] sm:$0xff]  ;;  %v938_v10 = vmov 0.0|0.0  }
  0x12   : > { %v1018_v18 = vld [vmem:[%s257_s8 + $0x10] sm:$0x3]  ;;  %v325_v19 = vmul.f32 %v323_v15, %v1016_v17  ;;  %v324_v21 = vmul.f32 %v323_v15, %v1014_v16  ;;  %v399_v29 = vmul.f32 %v397_v28, %v1016_v17  ;;  %v398_v31 = vmul.f32 %v397_v28, %v1014_v16  ;;  %887 = vmatprep.subr.bf16.mxu0 %v938_v10 }
  0x13   : > { %v326_v20 = vmul.f32 %v323_v15, %v1018_v18  ;;  %v400_v30 = vmul.f32 %v397_v28, %v1018_v18  ;;  %902 = vmatprep.subr.bf16.mxu1 %v938_v10 }
  0x14   : > { %v332_v22 = vrot.slane %v325_v19, 1  ;;  %v331_v24 = vrot.slane %v324_v21, 1  ;;  %v406_v39 = vrot.slane %v399_v29, 2  ;;  %v405_v41 = vrot.slane %v398_v31, 2  ;;  %v561_v21 = vld [vmem:[%s1168_s2] sm:$0xff] }
  0x15   : > { %419 = vrot.lane.b32.xlu0 %v417_v12, %s934_s25  ;;  %446 = vrot.lane.b32.xlu1 %v824_v13, %s935_s26  ;;  %v334_v23 = vrot.slane %v326_v20, 1  ;;  %v408_v40 = vrot.slane %v400_v30, 2  ;;  %v940_v19 = vmov 0.0   ;;  %v565_v29 = vld [vmem:[%s1168_s2 + $0x20] sm:$0xff]  ;;  %v566_v30 = vld [vmem:[%s1168_s2 + $0x28] sm:$0xff] }
  0x16   : > { %v1027_v26 = vsel %vm330_vm0, %v331_v24, %v332_v22  ;;  %v1045_v48 = vsel %vm404_vm1, %v405_v41, %v406_v39  ;;  %853 = vmatprep.mubr.msk.f32.mxu0 %vm939_vm2, %v940_v19  ;;  %881 = vmatprep.mubr.msk.f32.mxu1 %vm939_vm2, %v940_v19  ;;  %v563_v24 = vld [vmem:[%s1168_s2 + $0x10] sm:$0xff]  ;;  %v897_v31 = vpack.c.bf16 %v566_v30, %v565_v29 }
  0x17   : > { %v1024_v25 = vsel %vm330_vm0, %v332_v22, %v334_v23  ;;  %v1042_v47 = vsel %vm404_vm1, %v406_v39, %v408_v40  ;;  %v562_v22 = vld [vmem:[%s1168_s2 + $0x8] sm:$0xff]  ;;  %v894_v28 = vpack.c.bf16 %v564_v27, %v563_v24 }
  0x18   : > { %v891_v23 = vpack.c.bf16 %v562_v22, %v561_v21 }
  0x1a   : > { %906 = vmatpush3.bf16.msra.mxu1 %v891_v23 }
  0x1b   : > { %903 = vmatprep.subr.bf16.mxu1 %v938_v10 }
  0x1e   : > { %907 = vmatpush3.bf16.msra.mxu1 %v894_v28 }
  0x1f   : > { %904 = vmatprep.subr.bf16.mxu1 %v938_v10 }
  0x22   : > { %908 = vmatpush3.bf16.msra.mxu1 %v897_v31 }
  0x23   : > { %905 = vmatprep.subr.bf16.mxu1 %v938_v10 }
  0x7f   : > { %v286_v32 = vpop.permute.xlu0 %285  ;;  %v346_v33 = vpop.permute.xlu1 %345 }
  0x80   : > { %v288_v34 = vmul.f32 %v286_v32, %v1014_v16  ;;  %v289_v35 = vmul.f32 %v286_v32, %v1016_v17  ;;  %v348_v36 = vmul.f32 %v346_v33, %v1014_v16  ;;  %v349_v37 = vmul.f32 %v346_v33, %v1016_v17  ;;  %v567_v32 = vld [vmem:[%s1168_s2 + $0x30] sm:$0xff] }
  0x81   : > { %v350_v38 = vmul.f32 %v346_v33, %v1018_v18  ;;  %v568_v33 = vld [vmem:[%s1168_s2 + $0x38] sm:$0xff] }
  0x82   : > { %294 = vrot.lane.b32.xlu1 %v289_v35, %s936_s9  ;;  %292 = vrot.lane.b32.xlu0 %v288_v34, %s936_s9  ;;  %v354_v42 = vrot.slane %v348_v36, 1  ;;  %v355_v44 = vrot.slane %v349_v37, 1  ;;  %v900_v34 = vpack.c.bf16 %v568_v33, %v567_v32  ;;  %v276_v35 = vsub.s32 0, %v984_v1 }
  0x83   : > { %v306_v43 = vpop.permute.xlu0 %305  ;;  %v357_v45 = vrot.slane %v350_v38, 1  ;;  %v373_v46 = vpop.permute.xlu1 %372 }
  0x84   : > { %v308_v49 = vmul.f32 %v306_v43, %v1014_v16  ;;  %v309_v50 = vmul.f32 %v306_v43, %v1016_v17  ;;  %v375_v51 = vmul.f32 %v373_v46, %v1014_v16  ;;  %v376_v52 = vmul.f32 %v373_v46, %v1016_v17  ;;  %909 = vmatpush3.bf16.msra.mxu1 %v900_v34 }
  0x85   : > { %v377_v53 = vmul.f32 %v373_v46, %v1018_v18  ;;  %v358_v57 = vsel %vm330_vm0, %v355_v44, %v357_v45  ;;  %v356_v58 = vsel %vm330_vm0, %v354_v42, %v355_v44  ;;  %v277_v36 = vrot.slane %v989_v2, %v276_v35 }
  0x86   : > { %314 = vrot.lane.b32.xlu1 %v309_v50, %s937_s10  ;;  %312 = vrot.lane.b32.xlu0 %v308_v49, %s937_s10  ;;  %v381_v54 = vrot.slane %v375_v51, 1  ;;  %v382_v55 = vrot.slane %v376_v52, 1 }
  0x87   : > { %v384_v56 = vrot.slane %v377_v53, 1  ;;  %v420_v59 = vpop.permute.xlu0 %419  ;;  %v447_v60 = vpop.permute.xlu1 %446  ;;  %v279_v37 = vmul.f32 %v277_v36, %v1016_v17  ;;  %v278_v38 = vmul.f32 %v277_v36, %v1014_v16 }
  0x88   : > { %v422_v61 = vmul.f32 %v420_v59, %v1014_v16  ;;  %v423_v62 = vmul.f32 %v420_v59, %v1016_v17  ;;  %v424_v63 = vmul.f32 %v420_v59, %v1018_v18  ;;  %v383_v0 = vsel %vm330_vm0, %v381_v54, %v382_v55 }
  0x89   : > { %v385_v3 = vsel %vm330_vm0, %v382_v55, %v384_v56  ;;  %v449_v4 = vmul.f32 %v447_v60, %v1014_v16  ;;  %v450_v5 = vmul.f32 %v447_v60, %v1016_v17  ;;  %v451_v9 = vmul.f32 %v447_v60, %v1018_v18 }
  0x8a   : > { %361 = vrot.lane.b32.xlu1 %v358_v57, %s936_s9  ;;  %359 = vrot.lane.b32.xlu0 %v356_v58, %s936_s9  ;;  %v428_v6 = vrot.slane %v422_v61, 2  ;;  %v429_v7 = vrot.slane %v423_v62, 2  ;;  %v431_v8 = vrot.slane %v424_v63, 2 }
  0x8b   : > { %v455_v11 = vrot.slane %v449_v4, 2  ;;  %v456_v12 = vrot.slane %v450_v5, 2  ;;  %v458_v13 = vrot.slane %v451_v9, 2 }
  0x8c   : > { %v432_v14 = vsel %vm404_vm1, %v429_v7, %v431_v8  ;;  %v430_v15 = vsel %vm404_vm1, %v428_v6, %v429_v7 }
  0x8d   : > { %v459_v18 = vsel %vm404_vm1, %v456_v12, %v458_v13  ;;  %v457_v20 = vsel %vm404_vm1, %v455_v11, %v456_v12 }
  0x8e   : > { %388 = vrot.lane.b32.xlu1 %v385_v3, %s937_s10  ;;  %386 = vrot.lane.b32.xlu0 %v383_v0, %s937_s10  ;;  %v468_v0 = vld [vmem:[%s1169_s3] sm:$0xff] }
  0x92   : > { %435 = vrot.lane.b32.xlu1 %v432_v14, %s936_s9  ;;  %433 = vrot.lane.b32.xlu0 %v430_v15, %s936_s9 }
  0x96   : > { %462 = vrot.lane.b32.xlu1 %v459_v18, %s937_s10  ;;  %460 = vrot.lane.b32.xlu0 %v457_v20, %s937_s10 }
  0xf4   : > { %v295_v39 = vpop.permute.xlu1 %294  ;;  %v293_v40 = vpop.permute.xlu0 %292 }
  0xf5   : > { %v299_v41 = vadd.f32 %v295_v39, %v279_v37  ;;  %v298_v42 = vadd.f32 %v293_v40, %v278_v38 }
  0xf8   : > { %v315_v43 = vpop.permute.xlu1 %314  ;;  %v313_v44 = vpop.permute.xlu0 %312 }
  0xf9   : > { %v319_v45 = vadd.f32 %v315_v43, %v299_v41  ;;  %v318_v46 = vadd.f32 %v313_v44, %v298_v42 }
  0xfb   : > { %v339_v49 = vadd.f32 %v1024_v25, %v319_v45  ;;  %v338_v50 = vadd.f32 %v1027_v26, %v318_v46 }
  0xfc   : > { %v362_v51 = vpop.permute.xlu1 %361  ;;  %v360_v1 = vpop.permute.xlu0 %359 }
  0xfd   : > { %v366_v52 = vadd.f32 %v362_v51, %v339_v49  ;;  %v365_v2 = vadd.f32 %v360_v1, %v338_v50 }
 0x100   : > { %v389_v53 = vpop.permute.xlu1 %388  ;;  %v387_v17 = vpop.permute.xlu0 %386 }
 0x101   : > { %v393_v54 = vadd.f32 %v389_v53, %v366_v52  ;;  %v392_v16 = vadd.f32 %v387_v17, %v365_v2 }
 0x103   : > { %v413_v55 = vadd.f32 %v1042_v47, %v393_v54  ;;  %v412_v56 = vadd.f32 %v1045_v48, %v392_v16  ;;  %v469_v47 = vld [vmem:[%s1169_s3 + $0x8] sm:$0xff]  ;;  %v470_v48 = vld [vmem:[%s1169_s3 + $0x10] sm:$0x3] }
 0x104   : > { %v436_v57 = vpop.permute.xlu1 %435  ;;  %v434_v58 = vpop.permute.xlu0 %433 }
 0x105   : > { %v440_v59 = vadd.f32 %v436_v57, %v413_v55  ;;  %v439_v60 = vadd.f32 %v434_v58, %v412_v56 }
 0x108   : > { %v463_v61 = vpop.permute.xlu1 %462  ;;  %v461_v25 = vpop.permute.xlu0 %460 }
 0x109   : > { %v467_v62 = vadd.f32 %v463_v61, %v440_v59  ;;  %v466_v26 = vadd.f32 %v461_v25, %v439_v60 }
 0x10b   : > { %v888_v63 = vpack.c.bf16 %v467_v62, %v466_v26 }
 0x10d   : > { %889 = vmatpush3.bf16.msra.mxu0 %v888_v63 }
 0x10e   : > { %890 = vmatprep.subr.bf16.mxu0 %v938_v10 }
 0x110   : > { %854 = vmatmul.mubr.msk.f32.vlgmr.msra.gmra.mrb[0].mxu0 %vm471_vm3, %v468_v0 }
 0x111   : > { %856 = vmatprep.mubr.msk.f32.mxu0 %vm939_vm2, %v940_v19  ;;  %892 = vmatpush3.bf16.msra.mxu0 %v891_v23 }
 0x112   : > { %893 = vmatprep.subr.bf16.mxu0 %v938_v10 }
 0x114   : > { %857 = vmatmul.mubr.msk.f32.gmra.mrb[2].mxu0 %vm471_vm3, %v469_v47 }
 0x115   : > { %859 = vmatprep.mubr.msk.f32.mxu0 %vm939_vm2, %v940_v19  ;;  %895 = vmatpush3.bf16.msra.mxu0 %v894_v28 }
 0x116   : > { %896 = vmatprep.subr.bf16.mxu0 %v938_v10 }
 0x118   : > { %860 = vmatmul.mubr.msk.f32.gmra.mrb[4].mxu0 %vm471_vm3, %v470_v48 }
 0x119   : > { %898 = vmatpush3.bf16.msra.mxu0 %v897_v31  ;;  %878 = vmatprep.mubr.msk.f32.mxu0 %vm939_vm2, %v940_v19 }
 0x11a   : > { %899 = vmatprep.subr.bf16.mxu0 %v938_v10 }
 0x11d   : > { %901 = vmatpush3.bf16.msra.mxu0 %v900_v34 }
 0x1e3   : > { %v547_v3 = vpop.f32.mrb[0].mxu0 }
 0x1e4   : > { %v855_v4 = vpop.f32.mrb[1].mxu0  ;;  %879 = vmatmul.mubr.msk.f32.vlgmr.msra.gmra.mrb[6].mxu0 %vm569_vm4, %v547_v3 }
 0x1e7   : > { %v552_v5 = vpop.f32.mrb[2].mxu0 }
 0x1e8   : > { %v858_v6 = vpop.f32.mrb[3].mxu0  ;;  %882 = vmatmul.mubr.msk.f32.vlgmr.msra.gmra.mrb[0].mxu1 %vm569_vm4, %v552_v5 }
 0x1e9   : > { %884 = vmatprep.mubr.msk.f32.mxu1 %vm939_vm2, %v940_v19 }
 0x1eb   : > { %v557_v7 = vpop.f32.mrb[4].mxu0 }
 0x1ec   : > { %v861_v8 = vpop.f32.mrb[5].mxu0  ;;  %885 = vmatmul.mubr.msk.f32.gmra.mrb[2].mxu1 %vm569_vm4, %v557_v7 }
 0x2b7   : > { %v645_v9 = vpop.f32.mrb[6].mxu0 }
 0x2b8   : > { %660 = vst.msk [vmem:[%s262_s14] sm:$0xff] %vm659_vm5, %v645_v9  ;;  %v880_v10 = vpop.f32.mrb[7].mxu0  ;;  %v667_v12 = vrot.slane %v645_v9, 1 }
 0x2bb   : > { %v650_v11 = vpop.f32.mrb[0].mxu1 }
 0x2bc   : > { %661 = vst.msk [vmem:[%s262_s14 + $0x8] sm:$0xff] %vm659_vm5, %v650_v11  ;;  %v668_v13 = vrot.slane %v650_v11, 1  ;;  %v883_v14 = vpop.f32.mrb[1].mxu1 }
 0x2be   : > { %v669_v15 = vsel %vm330_vm0, %v667_v12, %v668_v13 }
 0x2bf   : > { %v655_v19 = vpop.f32.mrb[2].mxu1  ;;  %v674_v22 = vsel %vm659_vm5, %v669_v15, 0.0 }
 0x2c0   : > { %663 = vst.msk [vmem:[%s262_s14 + $0x10] sm:$0x3] %vm662_vm6, %v655_v19  ;;  %v670_v18 = vrot.slane %v655_v19, 1  ;;  %v886_v20 = vpop.f32.mrb[3].mxu1 }
 0x2c2   : > { %v671_v21 = vsel %vm330_vm0, %v668_v13, %v670_v18 }
 0x2c3   : > { %v675_v23 = vsel %vm659_vm5, %v671_v21, 0.0 }
 0x2c4   : > { %v676_v24 = vadd.f32 %v675_v23, %v674_v22 }
 0x2c6   : > { %v677_v27 = vrot.slane %v676_v24, 4 }
 0x2c8   : > { %v678_v28 = vadd.f32 %v677_v27, %v676_v24 }
 0x2ca   : > { %v679_v29 = vrot.slane %v678_v28, 2 }
 0x2cc   : > { %v680_v30 = vadd.f32 %v679_v29, %v678_v28 }
 0x2ce   : > { %v681_v31 = vrot.slane %v680_v30, 1 }
 0x2d0   : > { %v682_v32 = vadd.f32 %v681_v31, %v680_v30 }
 0x2d2   : > { %v683_v33 = vmul.f32 0.0625, %v682_v32  ;;  %688 = vst.msk [vmem:[%s265_s16] sm:$0x1] %vm687_vm7, %v682_v32 }
 0x2d4   : > { %v684_v34 = vsub.f32 %v645_v9, %v683_v33  ;;  %v685_v35 = vsub.f32 %v650_v11, %v683_v33  ;;  %v686_v36 = vsub.f32 %v655_v19, %v683_v33 }
 0x2d6   : > { %v689_v37 = vmul.f32 %v684_v34, %v684_v34  ;;  %v690_v38 = vmul.f32 %v685_v35, %v685_v35  ;;  %v691_v39 = vmul.f32 %v686_v36, %v686_v36 }
 0x2d8   : > { %v695_v40 = vrot.slane %v689_v37, 1  ;;  %v696_v41 = vrot.slane %v690_v38, 1  ;;  %v698_v42 = vrot.slane %v691_v39, 1 }
 0x2da   : > { %v697_v43 = vsel %vm330_vm0, %v695_v40, %v696_v41  ;;  %v699_v44 = vsel %vm330_vm0, %v696_v41, %v698_v42 }
 0x2db   : > { %v702_v45 = vsel %vm659_vm5, %v697_v43, 0.0  ;;  %v703_v46 = vsel %vm659_vm5, %v699_v44, 0.0 }
 0x2dc   : > { %v704_v49 = vadd.f32 %v703_v46, %v702_v45 }
 0x2de   : > { %v705_v50 = vrot.slane %v704_v49, 4 }
 0x2e0   : > { %v706_v51 = vadd.f32 %v705_v50, %v704_v49 }
 0x2e2   : > { %v707_v1 = vrot.slane %v706_v51, 2 }
 0x2e4   : > { %v708_v52 = vadd.f32 %v707_v1, %v706_v51 }
 0x2e6   : > { %v709_v2 = vrot.slane %v708_v52, 1 }
 0x2e8   : > { %v710_v53 = vadd.f32 %v709_v2, %v708_v52 }
 0x2ea   : > { %711 = vst.msk [vmem:[%s268_s19] sm:$0x1] %vm687_vm7, %v710_v53 }
 0x2eb PF: > { %s17_s21 = sadd.s32 1, %s932_s21  }
 0x2ec   : > { %p14_p4 = scmp.ge.s32.totalorder %s17_s21, 4  }
 0x2ee   :  { %16 = sbr.rel (!%p14_p4) target bundleno = 1 (0x1), region = 90 }

// kernel: tile.49
= control target key start
LH: loop header
LB: loop body
LE: loop exit
PB: predicated region body
PF: predicated region fallthrough
CT: control target
= control target key end

     0   :  { %s28_s0 = inlined_call_operand.vmem [shape: f32[8], index: 0, kind: input, shape index: {}]   ;;  %s29_s1 = inlined_call_operand.vmem [shape: f32[16,8], index: 1, kind: output, shape index: {}]  }
   0x1   :  { %v4_v0 = vld [vmem:[%s28_s0] ss:$0 sm:$0xff] }
   0x2   :  { %5 = vst [vmem:[%s29_s1] sm:$0xff] %v4_v0  ;;  %8 = vst [vmem:[%s29_s1 + $0x8] sm:$0xff] %v4_v0 }

// kernel: tile.55
= control target key start
LH: loop header
LB: loop body
LE: loop exit
PB: predicated region body
PF: predicated region fallthrough
CT: control target
= control target key end

     0   :  { %s131_s10 = smov 120   ;;  %s132_s11 = smov 104   ;;  %vm3_vm0 = vcmask 64512   ;;  %vm9_vm1 = vcmask 1048512   ;;  %vm15_vm2 = vcmask 982912   ;;  %vm21_vm3 = vcmask 917312   ;;  %s207_s0 = inlined_call_operand.vmem [shape: f32[16,8], index: 0, kind: input, shape index: {}]   ;;  %s208_s1 = inlined_call_operand.vmem [shape: f32[1,128], index: 1, kind: output, shape index: {}]  }
   0x1   :  { %v101_v0 = vld [vmem:[%s207_s0 + $0xf] sm:$0x1]   ;;  %v103_v1 = vld [vmem:[%s207_s0 + $0xd] sm:$0x1]   ;;  %v102_v2 = vld [vmem:[%s207_s0 + $0xe] sm:$0x1]  }
   0x2   :  { %7 = vrot.lane.b32.xlu0 %v101_v0, %s131_s10  ;;  %19 = vrot.lane.b32.xlu1 %v103_v1, %s132_s11  ;;  %v104_v3 = vld [vmem:[%s207_s0 + $0xc] sm:$0x1]   ;;  %s133_s16 = smov 112   ;;  %s134_s17 = smov 96   ;;  %v105_v4 = vld [vmem:[%s207_s0 + $0xb] sm:$0x1]  }
   0x3   :  { %v106_v5 = vld [vmem:[%s207_s0 + $0xa] sm:$0x1]   ;;  %v2_v6 = vld [vmem:[%s207_s0] sm:$0x1]   ;;  %s135_s24 = smov 88   ;;  %s136_s25 = smov 80  }
   0x4   :  { %4 = vst.msk [vmem:[#allocation0] sm:$0x1] %vm3_vm0, %v2_v6   ;;  %v107_v7 = vld [vmem:[%s207_s0 + $0x9] sm:$0x1]   ;;  %v108_v8 = vld [vmem:[%s207_s0 + $0x8] sm:$0x1]  }
   0x5   :  { %s137_s30 = smov 72   ;;  %s138_s2 = smov 64   ;;  %v109_v9 = vld [vmem:[%s207_s0 + $0x7] sm:$0x1]   ;;  %v110_v10 = vld [vmem:[%s207_s0 + $0x6] sm:$0x1]  }
   0x6   :  { %13 = vrot.lane.b32.xlu0 %v102_v2, %s133_s16  ;;  %25 = vrot.lane.b32.xlu1 %v104_v3, %s134_s17  ;;  %s139_s7 = smov 56   ;;  %s140_s8 = smov 48   ;;  %v111_v11 = vld [vmem:[%s207_s0 + $0x5] sm:$0x1]   ;;  %v112_v12 = vld [vmem:[%s207_s0 + $0x4] sm:$0x1]  }
   0x7   :  { %s141_s13 = smov 40   ;;  %s142_s14 = smov 32   ;;  %v113_v13 = vld [vmem:[%s207_s0 + $0x3] sm:$0x1]   ;;  %v114_v14 = vld [vmem:[%s207_s0 + $0x2] sm:$0x1]  }
   0x8   :  { %s143_s19 = smov 24   ;;  %s144_s20 = smov 16   ;;  %v115_v15 = vld [vmem:[%s207_s0 + $0x1] sm:$0x1]   ;;  %vm27_vm4 = vcmask 851712   ;;  %vm33_vm5 = vcmask 786112  }
   0x9   :  { %s145_s0 = smov 8   ;;  %vm39_vm6 = vcmask 720512   ;;  %vm45_vm7 = vcmask 654912   ;;  %vm51_vm8 = vcmask 589312   ;;  %vm57_vm9 = vcmask 523712  }
   0xa   :  { %31 = vrot.lane.b32.xlu0 %v105_v4, %s135_s24  ;;  %37 = vrot.lane.b32.xlu1 %v106_v5, %s136_s25  ;;  %vm63_vm10 = vcmask 458112   ;;  %vm69_vm11 = vcmask 392512   ;;  %vm75_vm12 = vcmask 326912   ;;  %vm81_vm13 = vcmask 261312  }
   0xb   :  { %vm87_vm14 = vcmask 195712   ;;  %vm93_vm15 = vcmask 130112  }
   0xe   :  { %43 = vrot.lane.b32.xlu0 %v107_v7, %s137_s30  ;;  %49 = vrot.lane.b32.xlu1 %v108_v8, %s138_s2 }
  0x12   :  { %55 = vrot.lane.b32.xlu0 %v109_v9, %s139_s7  ;;  %61 = vrot.lane.b32.xlu1 %v110_v10, %s140_s8 }
  0x16   :  { %67 = vrot.lane.b32.xlu0 %v111_v11, %s141_s13  ;;  %73 = vrot.lane.b32.xlu1 %v112_v12, %s142_s14 }
  0x1a   :  { %79 = vrot.lane.b32.xlu0 %v113_v13, %s143_s19  ;;  %85 = vrot.lane.b32.xlu1 %v114_v14, %s144_s20 }
  0x1e   :  { %91 = vrot.lane.b32.xlu0 %v115_v15, %s145_s0 }
  0x74   :  { %v8_v16 = vpop.permute.xlu0 %7   ;;  %v20_v17 = vpop.permute.xlu1 %19  }
  0x75   :  { %10 = vst.msk [vmem:[#allocation0] sm:$0x1] %vm9_vm1, %v8_v16  }
  0x78   :  { %v14_v18 = vpop.permute.xlu0 %13   ;;  %v26_v19 = vpop.permute.xlu1 %25  }
  0x79   :  { %16 = vst.msk [vmem:[#allocation0] sm:$0x1] %vm15_vm2, %v14_v18  }
  0x7a   :  { %22 = vst.msk [vmem:[#allocation0] sm:$0x1] %vm21_vm3, %v20_v17  }
  0x7b   :  { %28 = vst.msk [vmem:[#allocation0] sm:$0x1] %vm27_vm4, %v26_v19  }
  0x7c   :  { %v32_v20 = vpop.permute.xlu0 %31   ;;  %v38_v21 = vpop.permute.xlu1 %37  }
  0x7d   :  { %34 = vst.msk [vmem:[#allocation0] sm:$0x1] %vm33_vm5, %v32_v20  }
  0x7e   :  { %40 = vst.msk [vmem:[#allocation0] sm:$0x1] %vm39_vm6, %v38_v21  }
  0x80   :  { %v44_v22 = vpop.permute.xlu0 %43   ;;  %v50_v23 = vpop.permute.xlu1 %49  }
  0x81   :  { %46 = vst.msk [vmem:[#allocation0] sm:$0x1] %vm45_vm7, %v44_v22  }
  0x82   :  { %52 = vst.msk [vmem:[#allocation0] sm:$0x1] %vm51_vm8, %v50_v23  }
  0x84   :  { %v56_v24 = vpop.permute.xlu0 %55   ;;  %v62_v25 = vpop.permute.xlu1 %61  }
  0x85   :  { %58 = vst.msk [vmem:[#allocation0] sm:$0x1] %vm57_vm9, %v56_v24  }
  0x86   :  { %64 = vst.msk [vmem:[#allocation0] sm:$0x1] %vm63_vm10, %v62_v25  }
  0x88   :  { %v68_v26 = vpop.permute.xlu0 %67   ;;  %v74_v27 = vpop.permute.xlu1 %73  }
  0x89   :  { %70 = vst.msk [vmem:[#allocation0] sm:$0x1] %vm69_vm11, %v68_v26  }
  0x8a   :  { %76 = vst.msk [vmem:[#allocation0] sm:$0x1] %vm75_vm12, %v74_v27  }
  0x8c   :  { %v80_v28 = vpop.permute.xlu0 %79   ;;  %v86_v29 = vpop.permute.xlu1 %85  }
  0x8d   :  { %82 = vst.msk [vmem:[#allocation0] sm:$0x1] %vm81_vm13, %v80_v28  }
  0x8e   :  { %88 = vst.msk [vmem:[#allocation0] sm:$0x1] %vm87_vm14, %v86_v29  }
  0x90   :  { %v92_v30 = vpop.permute.xlu0 %91  }
  0x91   :  { %94 = vst.msk [vmem:[#allocation0] sm:$0x1] %vm93_vm15, %v92_v30  }
  0x98   :  { %v98_v31 = vld [vmem:[#allocation0] sm:$0x1] }
  0x99   :  { %100 = vst [vmem:[%s208_s1] sm:$0x1] %v98_v31 }

// kernel: sep_conv_forward.4
= control target key start
LH: loop header
LB: loop body
LE: loop exit
PB: predicated region body
PF: predicated region fallthrough
CT: control target
= control target key end

     0   :  { %s888_s24 = smov 0   ;;  %s1041_s0 = inlined_call_operand.vmem [shape: f32[2,18,72], index: 0, kind: input, shape index: {}]   ;;  %s1042_s1 = inlined_call_operand.vmem [shape: f32[1,72], index: 1, kind: input, shape index: {}]   ;;  %s1043_s2 = inlined_call_operand.vmem [shape: f32[1,72], index: 2, kind: input, shape index: {}]   ;;  %s1044_s3 = inlined_call_operand.vmem [shape: f32[9,64], index: 3, kind: input, shape index: {}]   ;;  %s1045_s4 = inlined_call_operand.vmem [shape: f32[64,128], index: 4, kind: input, shape index: {}]   ;;  %s1046_s5 = inlined_call_operand.vmem [shape: f32[2,16,128], index: 5, kind: output, shape index: {0}]   ;;  %s1047_s6 = inlined_call_operand.vmem [shape: f32[2,1,128], index: 6, kind: output, shape index: {1}]   ;;  %s1048_s7 = inlined_call_operand.vmem [shape: f32[2,1,128], index: 7, kind: output, shape index: {2}]  }
   0x1 LB: > { %s762_s25 = sadd.s32 4294967295, %s842_s24   ;;  %p766_p0 = scmp.ge.s32.totalorder %s842_s24, 1  ;;  %s842_s24 = sphi %s888_s24, %s18_s24  }
   0x2   : > { %p242_p1 = scmp.lt.s32.totalorder %s842_s24, 3 }
   0x4   : > { %p243_p2 = pnand %p766_p0, %p242_p1 }
   0x5   : > { %v322_v0 = vlaneseq (!%p243_p2)  ;;  %v901_v2 = vld [vmem:[%s1044_s3] sm:$0xff] (!%p243_p2)  ;;  %s844_s28 = smov (!%p243_p2), 4   ;;  %s845_s29 = smov (!%p243_p2), 8   ;;  %v772_v13 = vld [vmem:[%s1044_s3 + $0x8] ss:$0 sm:$0xff] (!%p243_p2)  ;;  %vm406_vm9 = vcmask (!%p243_p2), 1046528  }
   0x6   : > { %246 = sbr.rel (%p243_p2) target bundleno = 516 (0x204), region = 40  ;;  %p280_p3 = scmp.lt.s32.totalorder (!%p243_p2), %s762_s25, 1  ;;  %v770_v14 = vld [vmem:[%s1042_s1] ss:$0 sm:$0xff] (!%p243_p2)  ;;  %v545_v42 = vld [vmem:[%s1045_s4 + $0x8] sm:$0xff] (!%p243_p2)  ;;  %v546_v48 = vld [vmem:[%s1045_s4 + $0x10] sm:$0xff] (!%p243_p2) }
   0x7   : > { %v896_v1 = vshrl.u32 (!%p243_p2), %v322_v0, 7  ;;  %v327_v18 = vand.u32 (!%p243_p2), 127, %v322_v0  ;;  %v771_v23 = vld [vmem:[%s1043_s2] ss:$0 sm:$0xff] (!%p243_p2)  ;;  %v547_v49 = vld [vmem:[%s1045_s4 + $0x18] sm:$0xff] (!%p243_p2)  ;;  %v549_v62 = vld [vmem:[%s1045_s4 + $0x28] sm:$0xff] (!%p243_p2) }
   0x8   : > { %v544_v41 = vld [vmem:[%s1045_s4] sm:$0xff] (!%p243_p2)  ;;  %v811_v50 = vpack.c.bf16 (!%p243_p2), %v547_v49, %v546_v48  ;;  %s846_s8 = smov (!%p243_p2), 124   ;;  %vm480_vm10 = vcmask (!%p243_p2), 1045504   ;;  %s847_s13 = smov (!%p243_p2), 120   ;;  %vm552_vm11 = vcmask (!%p243_p2), 523264  }
   0x9   : > { %v358_v3 = vsub.s32 (!%p243_p2), 1, %v896_v1  ;;  %v378_v4 = vsub.s32 (!%p243_p2), 2, %v896_v1  ;;  %v418_v5 = vsub.s32 (!%p243_p2), 4, %v896_v1  ;;  %v445_v6 = vsub.s32 (!%p243_p2), 5, %v896_v1  ;;  %v548_v61 = vld [vmem:[%s1045_s4 + $0x20] sm:$0xff] (!%p243_p2) }
   0xa   : > { %v492_v11 = vsub.s32 (!%p243_p2), 7, %v896_v1  ;;  %v325_v19 = vadd.s32 (!%p243_p2), 16, %v896_v1  ;;  %vm337_vm0 = vcmp.ge.s32.totalorder (!%p243_p2), %v327_v18, 4  ;;  %vm328_vm1 = vcmp.ge.s32.totalorder (!%p243_p2), %v896_v1, 1 }
   0xb   : > { %v359_v7 = vrot.slane (!%p243_p2), %v901_v2, %v358_v3  ;;  %v419_v8 = vrot.slane (!%p243_p2), %v901_v2, %v418_v5  ;;  %v379_v9 = vrot.slane (!%p243_p2), %v901_v2, %v378_v4  ;;  %v446_v10 = vrot.slane (!%p243_p2), %v901_v2, %v445_v6  ;;  %vm338_vm4 = vmand (!%p243_p2), %vm328_vm1, %vm337_vm0 }
   0xc   : > { %v493_v12 = vrot.slane (!%p243_p2), %v901_v2, %v492_v11  ;;  %vm333_vm2 = vcmp.lt.s32.totalorder (!%p243_p2), %v325_v19, 17  ;;  %vm341_vm3 = vcmp.lt.s32.totalorder (!%p243_p2), %v327_v18, 68  ;;  %v398_v30 = vsub.s32 (!%p243_p2), 3, %v896_v1  ;;  %v551_v18 = vld [vmem:[%s1045_s4 + $0x38] sm:$0xff] (!%p243_p2) }
   0xd   : > { %361 = vrot.lane.b32.xlu0 %v359_v7, %s844_s28  ;;  %421 = vrot.lane.b32.xlu1 %v419_v8, %s844_s28  ;;  %s1050_s25 = smov (!%p280_p3, %s762_s25), 1  ;;  %vm340_vm5 = vmand %vm333_vm2, %vm337_vm0  ;;  %v807_v43 = vpack.c.bf16 %v545_v42, %v544_v41  ;;  %v472_v46 = vsub.s32 6, %v896_v1  ;;  %v815_v5 = vpack.c.bf16 %v549_v62, %v548_v61 }
   0xe   : > { %s823_s9 = smul.u32 24, %s1050_s25  ;;  %vm343_vm6 = vmand %vm337_vm0, %vm341_vm3  ;;  %v399_v31 = vrot.slane %v901_v2, %v398_v30  ;;  %s777_s14 = sshll.u32 %s1050_s25, 4 }
   0xf   : > { %vm342_vm7 = vmand %vm338_vm4, %vm341_vm3  ;;  %808 = vmatprep.subr.bf16.mxu0 %v807_v43  ;;  %v473_v47 = vrot.slane %v901_v2, %v472_v46  ;;  %s289_s17 = scalar_lea.vmem %s1046_s5, %s777_s14  ;;  %s292_s20 = scalar_lea.vmem %s1047_s6, %s1050_s25 }
  0x10   : > { %s284_s12 = scalar_lea.vmem %s1041_s0, %s823_s9  ;;  %vm344_vm8 = vmand %vm340_vm5, %vm341_vm3  ;;  %810 = vmatpush3.bf16.msra.mxu0 %v807_v43  ;;  %s295_s23 = scalar_lea.vmem %s1048_s7, %s1050_s25 }
  0x11   : > { %381 = vrot.lane.b32.xlu0 %v379_v9, %s845_s29  ;;  %448 = vrot.lane.b32.xlu1 %v446_v10, %s845_s29  ;;  %v296_v15 = vld [vmem:[%s284_s12] sm:$0xff]  ;;  %v297_v16 = vld [vmem:[%s284_s12 + $0x8] sm:$0xff] }
  0x12   : > { %v298_v17 = vld [vmem:[%s284_s12 + $0x10] sm:$0x3]  ;;  %v306_v20 = vsub.f32 %v296_v15, %v770_v14  ;;  %v307_v21 = vsub.f32 %v297_v16, %v770_v14  ;;  %812 = vmatprep.subr.bf16.mxu0 %v811_v50 }
  0x13   : > { %v308_v22 = vsub.f32 %v298_v17, %v770_v14  ;;  %v550_v17 = vld [vmem:[%s1045_s4 + $0x30] sm:$0xff] }
  0x14   : > { %v316_v24 = vmul.f32 %v771_v23, %v306_v20  ;;  %v317_v25 = vmul.f32 %v771_v23, %v307_v21  ;;  %814 = vmatpush3.bf16.msra.mxu0 %v811_v50  ;;  %v819_v21 = vpack.c.bf16 %v551_v18, %v550_v17 }
  0x15   : > { %495 = vrot.lane.b32.xlu0 %v493_v12, %s844_s28  ;;  %522 = vrot.lane.b32.xlu1 %v772_v13, %s845_s29  ;;  %v318_v26 = vmul.f32 %v771_v23, %v308_v22 }
  0x16   : > { %v319_v27 = vmax.f32 %v316_v24, 0.0  ;;  %v320_v28 = vmax.f32 %v317_v25, 0.0  ;;  %816 = vmatprep.subr.bf16.mxu0 %v815_v5 }
  0x17   : > { %v321_v29 = vmax.f32 %v318_v26, 0.0 }
  0x18   : > { %v932_v32 = vsel %vm342_vm7, %v319_v27, 0.0  ;;  %v934_v33 = vsel %vm343_vm6, %v320_v28, 0.0  ;;  %818 = vmatpush3.bf16.msra.mxu0 %v815_v5 }
  0x19   : > { %v936_v34 = vsel %vm344_vm8, %v321_v29, 0.0  ;;  %v401_v35 = vmul.f32 %v399_v31, %v934_v33  ;;  %v400_v37 = vmul.f32 %v399_v31, %v932_v32  ;;  %v475_v51 = vmul.f32 %v473_v47, %v934_v33  ;;  %820 = vmatprep.subr.bf16.mxu0 %v819_v21 }
  0x1a   : > { %v402_v36 = vmul.f32 %v399_v31, %v936_v34  ;;  %v476_v52 = vmul.f32 %v473_v47, %v936_v34  ;;  %v474_v53 = vmul.f32 %v473_v47, %v932_v32 }
  0x1b   : > { %v408_v38 = vrot.slane %v401_v35, 1  ;;  %v407_v40 = vrot.slane %v400_v37, 1  ;;  %v482_v63 = vrot.slane %v475_v51, 2 }
  0x1c   : > { %v410_v39 = vrot.slane %v402_v36, 1  ;;  %v484_v0 = vrot.slane %v476_v52, 2  ;;  %v481_v3 = vrot.slane %v474_v53, 2  ;;  %822 = vmatpush3.bf16.msra.mxu0 %v819_v21 }
  0x1d   : > { %v951_v45 = vsel %vm406_vm9, %v407_v40, %v408_v38 }
  0x1e   : > { %v948_v44 = vsel %vm406_vm9, %v408_v38, %v410_v39  ;;  %v978_v10 = vsel %vm480_vm10, %v482_v63, %v484_v0  ;;  %v981_v11 = vsel %vm480_vm10, %v481_v3, %v482_v63 }
  0x7f   : > { %v362_v54 = vpop.permute.xlu0 %361  ;;  %v422_v55 = vpop.permute.xlu1 %421 }
  0x80   : > { %v364_v56 = vmul.f32 %v362_v54, %v932_v32  ;;  %v365_v57 = vmul.f32 %v362_v54, %v934_v33  ;;  %v424_v58 = vmul.f32 %v422_v55, %v932_v32  ;;  %v425_v59 = vmul.f32 %v422_v55, %v934_v33 }
  0x81   : > { %v426_v60 = vmul.f32 %v422_v55, %v936_v34 }
  0x82   : > { %370 = vrot.lane.b32.xlu1 %v365_v57, %s846_s8  ;;  %368 = vrot.lane.b32.xlu0 %v364_v56, %s846_s8  ;;  %v430_v4 = vrot.slane %v424_v58, 1  ;;  %v431_v7 = vrot.slane %v425_v59, 1 }
  0x83   : > { %v382_v6 = vpop.permute.xlu0 %381  ;;  %v433_v8 = vrot.slane %v426_v60, 1  ;;  %v449_v9 = vpop.permute.xlu1 %448 }
  0x84   : > { %v384_v12 = vmul.f32 %v382_v6, %v932_v32  ;;  %v385_v13 = vmul.f32 %v382_v6, %v934_v33  ;;  %v451_v14 = vmul.f32 %v449_v9, %v932_v32  ;;  %v452_v15 = vmul.f32 %v449_v9, %v934_v33 }
  0x85   : > { %v453_v16 = vmul.f32 %v449_v9, %v936_v34  ;;  %v434_v23 = vsel %vm406_vm9, %v431_v7, %v433_v8  ;;  %v432_v24 = vsel %vm406_vm9, %v430_v4, %v431_v7 }
  0x86   : > { %390 = vrot.lane.b32.xlu1 %v385_v13, %s847_s13  ;;  %388 = vrot.lane.b32.xlu0 %v384_v12, %s847_s13  ;;  %v457_v19 = vrot.slane %v451_v14, 1  ;;  %v458_v20 = vrot.slane %v452_v15, 1 }
  0x87   : > { %v460_v22 = vrot.slane %v453_v16, 1  ;;  %v496_v25 = vpop.permute.xlu0 %495  ;;  %v523_v26 = vpop.permute.xlu1 %522 }
  0x88   : > { %v498_v27 = vmul.f32 %v496_v25, %v932_v32  ;;  %v499_v28 = vmul.f32 %v496_v25, %v934_v33  ;;  %v500_v29 = vmul.f32 %v496_v25, %v936_v34  ;;  %v459_v30 = vsel %vm406_vm9, %v457_v19, %v458_v20 }
  0x89   : > { %v461_v31 = vsel %vm406_vm9, %v458_v20, %v460_v22  ;;  %v525_v35 = vmul.f32 %v523_v26, %v932_v32  ;;  %v526_v36 = vmul.f32 %v523_v26, %v934_v33  ;;  %v527_v40 = vmul.f32 %v523_v26, %v936_v34 }
  0x8a   : > { %437 = vrot.lane.b32.xlu1 %v434_v23, %s846_s8  ;;  %435 = vrot.lane.b32.xlu0 %v432_v24, %s846_s8  ;;  %v504_v37 = vrot.slane %v498_v27, 2  ;;  %v505_v38 = vrot.slane %v499_v28, 2  ;;  %v507_v39 = vrot.slane %v500_v29, 2  ;;  %v352_v34 = vsub.s32 0, %v896_v1 }
  0x8b   : > { %v531_v41 = vrot.slane %v525_v35, 2  ;;  %v532_v42 = vrot.slane %v526_v36, 2  ;;  %v534_v43 = vrot.slane %v527_v40, 2 }
  0x8c   : > { %v508_v46 = vsel %vm480_vm10, %v505_v38, %v507_v39  ;;  %v506_v47 = vsel %vm480_vm10, %v504_v37, %v505_v38  ;;  %v353_v50 = vrot.slane %v901_v2, %v352_v34 }
  0x8d   : > { %v535_v48 = vsel %vm480_vm10, %v532_v42, %v534_v43  ;;  %v533_v49 = vsel %vm480_vm10, %v531_v41, %v532_v42 }
  0x8e   : > { %464 = vrot.lane.b32.xlu1 %v461_v31, %s847_s13  ;;  %462 = vrot.lane.b32.xlu0 %v459_v30, %s847_s13  ;;  %v355_v51 = vmul.f32 %v353_v50, %v934_v33  ;;  %v354_v52 = vmul.f32 %v353_v50, %v932_v32 }
  0x92   : > { %511 = vrot.lane.b32.xlu1 %v508_v46, %s846_s8  ;;  %509 = vrot.lane.b32.xlu0 %v506_v47, %s846_s8 }
  0x96   : > { %538 = vrot.lane.b32.xlu1 %v535_v48, %s847_s13  ;;  %536 = vrot.lane.b32.xlu0 %v533_v49, %s847_s13 }
  0xf4   : > { %v371_v53 = vpop.permute.xlu1 %370  ;;  %v369_v54 = vpop.permute.xlu0 %368 }
  0xf5   : > { %v375_v55 = vadd.f32 %v371_v53, %v355_v51  ;;  %v374_v56 = vadd.f32 %v369_v54, %v354_v52 }
  0xf8   : > { %v391_v57 = vpop.permute.xlu1 %390  ;;  %v389_v58 = vpop.permute.xlu0 %388 }
  0xf9   : > { %v395_v59 = vadd.f32 %v391_v57, %v375_v55  ;;  %v394_v60 = vadd.f32 %v389_v58, %v374_v56 }
  0xfb   : > { %v415_v61 = vadd.f32 %v948_v44, %v395_v59  ;;  %v414_v62 = vadd.f32 %v951_v45, %v394_v60 }
  0xfc   : > { %v438_v63 = vpop.permute.xlu1 %437  ;;  %v436_v1 = vpop.permute.xlu0 %435 }
  0xfd   : > { %v442_v0 = vadd.f32 %v438_v63, %v415_v61  ;;  %v441_v2 = vadd.f32 %v436_v1, %v414_v62 }
 0x100   : > { %v465_v3 = vpop.permute.xlu1 %464  ;;  %v463_v33 = vpop.permute.xlu0 %462 }
 0x101   : > { %v469_v32 = vadd.f32 %v465_v3, %v442_v0  ;;  %v468_v4 = vadd.f32 %v463_v33, %v441_v2 }
 0x103   : > { %v489_v5 = vadd.f32 %v978_v10, %v469_v32  ;;  %v488_v6 = vadd.f32 %v981_v11, %v468_v4 }
 0x104   : > { %v512_v7 = vpop.permute.xlu1 %511  ;;  %v510_v8 = vpop.permute.xlu0 %509 }
 0x105   : > { %v516_v9 = vadd.f32 %v512_v7, %v489_v5  ;;  %v515_v12 = vadd.f32 %v510_v8, %v488_v6 }
 0x108   : > { %v539_v44 = vpop.permute.xlu1 %538  ;;  %v537_v13 = vpop.permute.xlu0 %536 }
 0x109   : > { %v543_v45 = vadd.f32 %v539_v44, %v516_v9  ;;  %v542_v14 = vadd.f32 %v537_v13, %v515_v12 }
 0x10b   : > { %804 = vmatprep.mubr.msk.f32.mxu0 %vm552_vm11, %v542_v14 }
 0x10c   : > { %805 = vmatmul.mubr.msk.f32.vlgmr.msra.gmra.mrb[0].mxu0 %vm552_vm11, %v543_v45 }
 0x1df   : > { %v806_v10 = vpop.f32.mrb[0].mxu0 }
 0x1e0   : > { %v625_v15 = vpop.f32.mrb[1].mxu0  ;;  %635 = vst [vmem:[%s289_s17 + $0x8] sm:$0xff] %v806_v10 }
 0x1e1   : > { %634 = vst [vmem:[%s289_s17] sm:$0xff] %v625_v15  ;;  %v636_v11 = vadd.f32 %v806_v10, %v625_v15 }
 0x1e3   : > { %v637_v16 = vrot.slane %v636_v11, 4 }
 0x1e5   : > { %v638_v17 = vadd.f32 %v637_v16, %v636_v11 }
 0x1e7   : > { %v639_v18 = vrot.slane %v638_v17, 2 }
 0x1e9   : > { %v640_v19 = vadd.f32 %v639_v18, %v638_v17 }
 0x1eb   : > { %v641_v20 = vrot.slane %v640_v19, 1 }
 0x1ed   : > { %v642_v21 = vadd.f32 %v641_v20, %v640_v19 }
 0x1ef   : > { %v643_v22 = vmul.f32 0.0625, %v642_v21  ;;  %646 = vst [vmem:[%s292_s20] sm:$0x1] %v642_v21 }
 0x1f1   : > { %v644_v23 = vsub.f32 %v625_v15, %v643_v22  ;;  %v645_v24 = vsub.f32 %v806_v10, %v643_v22 }
 0x1f3   : > { %v647_v25 = vmul.f32 %v644_v23, %v644_v23  ;;  %v648_v26 = vmul.f32 %v645_v24, %v645_v24 }
 0x1f5   : > { %v649_v27 = vadd.f32 %v648_v26, %v647_v25 }
 0x1f7   : > { %v650_v28 = vrot.slane %v649_v27, 4 }
 0x1f9   : > { %v651_v29 = vadd.f32 %v650_v28, %v649_v27 }
 0x1fb   : > { %v652_v30 = vrot.slane %v651_v29, 2 }
 0x1fd   : > { %v653_v31 = vadd.f32 %v652_v30, %v651_v29 }
 0x1ff   : > { %v654_v35 = vrot.slane %v653_v31, 1 }
 0x201   : > { %v655_v36 = vadd.f32 %v654_v35, %v653_v31 }
 0x203   : > { %656 = vst [vmem:[%s295_s23] sm:$0x1] %v655_v36 }
 0x204 PF: > { %s18_s24 = sadd.s32 1, %s842_s24  }
 0x205   : > { %p15_p4 = scmp.ge.s32.totalorder %s18_s24, 4  }
 0x207   :  { %17 = sbr.rel (!%p15_p4) target bundleno = 1 (0x1), region = 94 }

// kernel: sep_conv_forward.5
= control target key start
LH: loop header
LB: loop body
LE: loop exit
PB: predicated region body
PF: predicated region fallthrough
CT: control target
= control target key end

     0   :  { %s261_s12 = smov 0   ;;  %s297_s0 = inlined_call_operand.vmem [shape: f32[32,128], index: 0, kind: input, shape index: {}]   ;;  %s298_s1 = inlined_call_operand.vmem [shape: f32[1,128], index: 1, kind: input, shape index: {}]   ;;  %s299_s2 = inlined_call_operand.vmem [shape: f32[1,128], index: 2, kind: input, shape index: {}]   ;;  %s300_s3 = inlined_call_operand.vmem [shape: f32[32,128], index: 3, kind: output, shape index: {}]  }
   0x1 LB: > { %s238_s13 = sadd.s32 4294967295, %s263_s12   ;;  %p242_p0 = scmp.ge.s32.totalorder %s263_s12, 1  ;;  %s263_s12 = sphi %s261_s12, %s13_s12  }
   0x2   : > { %p136_p1 = scmp.lt.s32.totalorder %s263_s12, 5 }
   0x4   : > { %p137_p2 = pnand %p242_p0, %p136_p1 }
   0x5   : > { %p158_p3 = scmp.lt.s32.totalorder (!%p137_p2), %s238_s13, 3  ;;  %v245_v0 = vld [vmem:[%s298_s1] ss:$0 sm:$0xff] (!%p137_p2) }
   0x6   : > { %140 = sbr.rel (%p137_p2) target bundleno = 24 (0x18), region = 32  ;;  %v246_v2 = vld [vmem:[%s299_s2] ss:$0 sm:$0xff] (!%p137_p2) }
   0xd   : > { %s302_s13 = smov (!%p158_p3, %s238_s13), 3 }
   0xe   : > { %s243_s14 = sshll.u32 %s302_s13, 3 }
   0xf   : > { %s161_s19 = scalar_lea.vmem %s297_s0, %s243_s14  ;;  %s165_s24 = scalar_lea.vmem %s300_s3, %s243_s14 }
  0x10   : > { %v166_v1 = vld [vmem:[%s161_s19] sm:$0xff] }
  0x11   : > { %v174_v3 = vsub.f32 %v166_v1, %v245_v0 }
  0x13   : > { %v182_v4 = vmul.f32 %v246_v2, %v174_v3 }
  0x15   : > { %v183_v5 = vmax.f32 %v182_v4, 0.0 }
  0x17   : > { %184 = vst [vmem:[%s165_s24] sm:$0xff] %v183_v5 }
  0x18 PF: > { %s13_s12 = sadd.s32 1, %s263_s12  }
  0x19   : > { %p10_p4 = scmp.ge.s32.totalorder %s13_s12, 6  }
  0x1b   :  { %12 = sbr.rel (!%p10_p4) target bundleno = 1 (0x1), region = 62 }

</bundles_post_ra>
